<compile_context>
chip_gen: v7x
topology: tpu7x:2x2x1
jax: 0.10.0
libtpu: 0.0.40
codegen_flags: <defaults>
</compile_context>

<pallas_src>
import functools
import math

import numpy as np
import jax
import jax.numpy as jnp
from jax import lax
from jax.experimental import pallas as pl
from jax.experimental.pallas import tpu as pltpu

PRELU_ALPHA = 0.25  # nn.PReLU() default init


def _prelu(x):
    return jnp.where(x >= 0.0, x, PRELU_ALPHA * x)


# ---------------------------------------------------------------------------
# Fused per-timestep kernel: node MLP chains + pairwise risk for one step.
# ---------------------------------------------------------------------------
def fused_step_kernel(pa_ref, pc_ref, fcol_ref, clu_ref, mask_ref,
                      wa_ref, wb_ref, wc_ref, out_ref, *, n_agents):
    N = n_agents
    f32 = jnp.float32
    bf16 = jnp.bfloat16

    # ---- unpack the packed weight slabs ------------------------------------
    wa = wa_ref[...]                        # (22, 128) fp32: layer-1 W/b + all biases
    ws1, bs1 = wa[0:1, :], wa[1:2, :]
    w51, b51 = wa[2:6, :], wa[6:7, :]
    w61, b61 = wa[7:11, :], wa[11:12, :]
    wr1, br1 = wa[12:16, :], wa[16:17, :]
    bs2, b52 = wa[17:18, 0:64], wa[17:18, 64:128]
    b62, br2 = wa[18:19, 0:64], wa[18:19, 64:128]
    bs3, b53, br3 = wa[19:20, 0:1], wa[19:20, 1:2], wa[19:20, 2:3]
    b63 = wa[20:21, 0:64]
    wr3_row = wa[21:22, 0:64]               # (1, 64)

    wb = wb_ref[...]                        # (256, 128) bf16: [[ws2|w52],[w62|wr2]]
    wb0, wb1 = wb[0:128, :], wb[128:256, :]
    wc = wc_ref[...]                        # (64, 128) bf16: lanes 0=ws3,1=w53,64:128=w63

    # ---- node path: shared scalar MLP over 4 features x N agents -----------
    fcol = fcol_ref[...]                    # (4N, 1) = [x | y | v | angle] rows
    h = _prelu(fcol * ws1 + bs1)                                            # (4N,128)
    hs = _prelu(jnp.dot(h.astype(bf16), wb0,
                        preferred_element_type=f32)[:, 0:64] + bs2)         # (4N,64)
    sm = _prelu(jnp.dot(hs.astype(bf16), wc,
                        preferred_element_type=f32)[:, 0:1] + bs3)          # (4N,1)
    xm, ym = sm[0:N], sm[N:2 * N]
    vm, am = sm[2 * N:3 * N], sm[3 * N:4 * N]

    def layer1(w1, b1):                     # 4->128 decomposed into rank-1 updates
        return _prelu(xm * w1[0:1, :] + ym * w1[1:2, :]
                      + vm * w1[2:3, :] + am * w1[3:4, :] + b1)             # (N,128)

    # 4->1 head (node scalar feeding the pairwise MLP)
    z5 = layer1(w51, b51)
    h5 = _prelu(jnp.dot(z5.astype(bf16), wb0,
                        preferred_element_type=f32)[:, 64:128] + b52)       # (N,64)
    node = _prelu(jnp.dot(h5.astype(bf16), wc,
                          preferred_element_type=f32)[:, 1:2] + b53)        # (N,1)

    # 4->64 head (node_ou_64 output)
    z6 = layer1(w61, b61)
    h6 = _prelu(jnp.dot(z6.astype(bf16), wb1,
                        preferred_element_type=f32)[:, 0:64] + b62)         # (N,64)
    node64 = _prelu(jnp.dot(h6.astype(bf16), wc,
                            preferred_element_type=f32)[:, 64:128] + b63)   # (N,64)

    # ---- pairwise geometry (kept fp32) --------------------------------------
    pa = pa_ref[...]                        # (N, 6) = [x, y, v, angle, cos, sin]
    pc = pc_ref[...]                        # (6, N) same features, neighbor j on lanes
    xi, yi, vi = pa[:, 0:1], pa[:, 1:2], pa[:, 2:3]
    ci, si = pa[:, 4:5], pa[:, 5:6]
    xj, yj, vj = pc[0:1, :], pc[1:2, :], pc[2:3, :]
    cj, sj = pc[4:5, :], pc[5:6, :]

    ddx = xj - xi                           # (N, N)
    ddy = yj - yi
    d2 = ddx * ddx + ddy * ddy
    nz = (d2 > 0.0).astype(f32)
    inv_dis = lax.rsqrt(jnp.where(d2 > 0.0, d2, 1.0)) * nz    # EUP, NaN-free
    cos3 = jnp.abs(ddx) * inv_dis
    sin3 = jnp.where(ddx == 0.0, 1.0,
                     jnp.where(ddx >= 0.0, 1.0, -1.0) * ddy * inv_dis)
    c13 = ci * cos3 + si * sin3             # cos(angle_i - angle3)
    c23 = cj * cos3 + sj * sin3             # cos(angle_j - angle3)
    lij = (c13 > 0.0).astype(f32)           # |angle_i - angle3| < pi/2
    vv = jnp.abs(vi * c13 - vj * c23)
    base = vv * inv_dis * lij * mask_ref[...]                 # (N, N) = risk1*lij*mask

    # ---- pairwise MLP (layer-1 split into i-side / j-side rank-1 halves) ----
    clu = clu_ref[...]                      # (N, 1)
    rowp = node * wr1[0:1, :] + clu * wr1[2:3, :] + br1       # (N, 128) i side
    colp = node * wr1[1:2, :] + clu * wr1[3:4, :]             # (N, 128) j side
    rr = jnp.broadcast_to(rowp.reshape(N, 1, 128), (N, N, 128))   # stride-0 broadcast
    cc = jnp.broadcast_to(colp.reshape(1, N, 128), (N, N, 128))   # stride-0 broadcast
    h1 = _prelu(rr + cc).reshape(N * N, 128)
    h2 = _prelu(jnp.dot(h1.astype(bf16), wb1,
                        preferred_element_type=f32)[:, 64:128] + br2)       # (N*N,64)
    bb = _prelu(jnp.sum(h2.reshape(N, N, 64) * wr3_row.reshape(1, 1, 64),
                        axis=-1) + br3)                                     # (N, N)

    # ---- single lane-dense output slab: [node64 | risk | zero-pad] ----------
    out_ref[:, 0:64] = node64
    out_ref[:, 64:64 + N] = base * bb
    if N < 64:
        out_ref[:, 64 + N:128] = jnp.zeros((N, 64 - N), f32)


# ---------------------------------------------------------------------------
# pallas_call wrapper: time-tiled grid, weights resident in VMEM.
# ---------------------------------------------------------------------------
def fused_pallas(pa_row, pa_col, fcol, clu, mask, wA, wB, wC, *, n_agents, n_steps):
    N = n_agents
    Tm1 = n_steps
    kernel = functools.partial(fused_step_kernel, n_agents=N)
    step = lambda t: (t, 0, 0)      # one timestep per grid step
    fix2 = lambda t: (0, 0)         # resident across all steps

    return pl.pallas_call(
        kernel,
        grid=(Tm1,),
        in_specs=[
            pl.BlockSpec((None, N, 6), step),        # pa_row  (Tm1, N, 6)
            pl.BlockSpec((None, 6, N), step),        # pa_col  (Tm1, 6, N)
            pl.BlockSpec((None, 4 * N, 1), step),    # fcol    (Tm1, 4N, 1)
            pl.BlockSpec((N, 1), fix2),              # clu     (N, 1)    resident
            pl.BlockSpec((N, N), fix2),              # mask    (N, N)    resident
            pl.BlockSpec(wA.shape, fix2),            # wA fp32 (22, 128) resident
            pl.BlockSpec(wB.shape, fix2),            # wB bf16 (256,128) resident
            pl.BlockSpec(wC.shape, fix2),            # wC bf16 (64, 128) resident
        ],
        out_specs=pl.BlockSpec((None, N, 128), step),
        out_shape=jax.ShapeDtypeStruct((Tm1, N, 128), jnp.float32),
        compiler_params=pltpu.CompilerParams(
            dimension_semantics=("parallel",)),      # steps independent -> megacore v7x
    )(pa_row, pa_col, fcol, clu, mask, wA, wB, wC)


# ---------------------------------------------------------------------------
# Parameter init (deterministic, torch-Linear-like kaiming-uniform bounds)
# ---------------------------------------------------------------------------
def init_params(key):
    def lin(k, fan_in, fan_out):
        k1, k2 = jax.random.split(k)
        bound = 1.0 / math.sqrt(fan_in)
        w = jax.random.uniform(k1, (fan_in, fan_out), jnp.float32, -bound, bound)
        b = jax.random.uniform(k2, (1, fan_out), jnp.float32, -bound, bound)
        return w, b

    keys = jax.random.split(key, 12)
    params = {}
    params["s"] = [*lin(keys[0], 1, 128), *lin(keys[1], 128, 64), *lin(keys[2], 64, 1)]
    params["m5"] = [*lin(keys[3], 4, 128), *lin(keys[4], 128, 64), *lin(keys[5], 64, 1)]
    params["m6"] = [*lin(keys[6], 4, 128), *lin(keys[7], 128, 64), *lin(keys[8], 64, 64)]
    params["risk"] = [*lin(keys[9], 4, 128), *lin(keys[10], 128, 64), *lin(keys[11], 64, 1)]
    return params


def pack_params(params):
    """Pack the 18 weight/bias tensors into 3 lane-dense VMEM slabs."""
    ws1, bs1, ws2, bs2, ws3, bs3 = params["s"]
    w51, b51, w52, b52, w53, b53 = params["m5"]
    w61, b61, w62, b62, w63, b63 = params["m6"]
    wr1, br1, wr2, br2, wr3, br3 = params["risk"]

    # fp32 slab: layer-1 weights/biases + layer-2/3 biases + wr3 row  -> (22, 128)
    row_b23 = jnp.concatenate([bs2, b52], axis=1)
    row_b6r = jnp.concatenate([b62, br2], axis=1)
    row_b3 = (jnp.zeros((1, 128), jnp.float32)
              .at[:, 0:1].set(bs3).at[:, 1:2].set(b53).at[:, 2:3].set(br3))
    row_b63 = jnp.zeros((1, 128), jnp.float32).at[:, 0:64].set(b63)
    row_wr3 = jnp.zeros((1, 128), jnp.float32).at[:, 0:64].set(jnp.transpose(wr3))
    wA = jnp.concatenate([ws1, bs1, w51, b51, w61, b61, wr1, br1,
                          row_b23, row_b6r, row_b3, row_b63, row_wr3], axis=0)

    # bf16 slab: 128->64 matmul weights, lane-dense 128 wide        -> (256, 128)
    wB = jnp.concatenate([jnp.concatenate([ws2, w52], axis=1),
                          jnp.concatenate([w62, wr2], axis=1)],
                         axis=0).astype(jnp.bfloat16)

    # bf16 slab: 64->out matmul weights                              -> (64, 128)
    wC = (jnp.zeros((64, 128), jnp.float32)
          .at[:, 0:1].set(ws3).at[:, 1:2].set(w53)
          .at[:, 64:128].set(w63)).astype(jnp.bfloat16)
    return wA, wB, wC


# ---------------------------------------------------------------------------
# Full forward pass (glue in JAX/numpy, hot path in the fused kernel)
# ---------------------------------------------------------------------------
def risk_interaction_forward(params, cluster, a, start, end, sa_out, se_out,
                             pedestrian_index, vehicle_index, rider_index):
    # layout: a is (N_agents, 2, T); the kernel runs on time-major data.
    a = jnp.asarray(a, jnp.float32)
    sa_out = jnp.asarray(sa_out, jnp.float32)
    se_out = jnp.asarray(se_out, jnp.float32)
    a_perm = jnp.transpose(a, (2, 0, 1))            # (T, N, 2)
    T, N, _ = a_perm.shape
    Tm1 = T - 1
    M = sa_out.shape[1]
    NM = N + M
    assert N <= 64  # TODO(synk): spill risk into a second padded output when N > 64

    clu = jnp.asarray(cluster, jnp.float32)[start:end].reshape(N, 1)

    # --- ped / veh split (static python glue) --------------------------------
    ped_set = set(int(i) for i in pedestrian_index)
    ped_ii = [ii for ii, ind in enumerate(range(start, end)) if ind in ped_set]
    veh_ii = [ii for ii, ind in enumerate(range(start, end)) if ind not in ped_set]
    n_ped, n_veh = len(ped_ii), len(veh_ii)

    # Which (i, j) entries get written.  The reference's spatial-window check
    # `lo < x < lo` is always False, so the `else` branch (j < len(ped/veh_ii))
    # is what executes.
    mask_np = np.zeros((N, N), np.float32)
    for i in ped_ii:
        mask_np[i, :n_ped] = 1.0
    for i in veh_ii:
        mask_np[i, :n_veh] = 1.0
    np.fill_diagonal(mask_np, 0.0)
    mask = jnp.asarray(mask_np)

    # --- per-agent glue features: x, y, v, angle, cos(angle), sin(angle) -----
    prev, cur = a_perm[:-1], a_perm[1:]
    dx = cur[..., 0:1] - prev[..., 0:1]
    dy = cur[..., 1:2] - prev[..., 1:2]
    r = jnp.sqrt(dx * dx + dy * dy)
    v = r / 0.5
    angle = jnp.where(dx == 0.0, jnp.float32(np.pi / 2),
                      jnp.arctan(dy / jnp.where(dx == 0.0, 1.0, dx)))
    r_safe = jnp.where(r == 0.0, 1.0, r)
    cos_a = jnp.where(dx == 0.0, 0.0, jnp.abs(dx) / r_safe)
    sin_a = jnp.where(dx == 0.0, 1.0,
                      jnp.where(dx >= 0.0, 1.0, -1.0) * dy / r_safe)
    feat6 = jnp.concatenate([cur[..., 0:1], cur[..., 1:2], v, angle, cos_a, sin_a],
                            axis=-1)                         # (T-1, N, 6)

    pa_row = feat6                                           # (Tm1, N, 6)
    pa_col = jnp.transpose(feat6, (0, 2, 1))                 # (Tm1, 6, N)
    fcol = jnp.transpose(feat6[..., 0:4], (0, 2, 1)).reshape(Tm1, 4 * N, 1)

    wA, wB, wC = pack_params(params)

    # --- single fused, time-tiled Pallas kernel ------------------------------
    out = fused_pallas(pa_row, pa_col, fcol, clu, mask, wA, wB, wC,
                       n_agents=N, n_steps=Tm1)              # (Tm1, N, 128)
    node64_tm1 = out[:, :, 0:64]                             # (T-1, N, 64)
    risk_tm1 = out[:, :, 64:64 + N]                          # (T-1, N, N)

    # --- assemble outputs (first row duplicated, as in the reference) --------
    node_ou_64 = jnp.concatenate([node64_tm1[0:1], node64_tm1], axis=0)    # (T, N, 64)
    risk_inter_out = jnp.concatenate([risk_tm1[0:1], risk_tm1], axis=0)    # (T, N, N)

    scene_graph_a = jnp.concatenate([a_perm, sa_out[:, :, -2:]], axis=1)   # (T, N+M, 2)

    # scene_graph_e: copy se_out into the top-left corner, then set edges for
    # pedestrian indices when any of the sa_out flags {0,1,4,5} equals 1.0.
    Se0, Se1 = se_out.shape[0], se_out.shape[1]
    e_base = jnp.zeros((T, NM, NM), jnp.float32).at[:Se0, :Se1, :Se1].set(se_out)
    flag = ((sa_out[:, :, 0] == 1.0) | (sa_out[:, :, 1] == 1.0) |
            (sa_out[:, :, 4] == 1.0) | (sa_out[:, :, 5] == 1.0))
    flag = flag.at[0].set(False)                                  # loop starts at k = 1
    ped_onehot = np.zeros((N,), np.float32)
    ped_onehot[ped_ii] = 1.0
    e_val = np.arange(NM)[None, :] - np.arange(M)[:, None]        # (M, NM): col - kk
    U = np.where((e_val >= 0) & (e_val < N),
                 ped_onehot[np.clip(e_val, 0, N - 1)], 0.0).astype(np.float32)
    set_mask = flag[:, :, None].astype(jnp.float32) * jnp.asarray(U)[None]
    rows = jnp.where(set_mask > 0, 1.0, e_base[:, :M, :])
    scene_graph_e = e_base.at[:, :M, :].set(rows)

    return risk_inter_out, scene_graph_a, scene_graph_e, node_ou_64


if __name__ == "__main__":
    key = jax.random.PRNGKey(0)
    kp, ka, ksa, kse, kc, kf = jax.random.split(key, 6)

    T, N, M, F = 6, 8, 4, 10          # timesteps, agents, sa rows, sa features
    start, end = 1, 9                 # end - start == N
    total = 12

    params = init_params(kp)
    a = jax.random.normal(ka, (N, 2, T), jnp.float32) * 5.0       # (N, coord, T)
    sa_out = jax.random.normal(ksa, (T, M, F), jnp.float32)
    flags = (jax.random.uniform(kf, (T, M, 6)) > 0.5).astype(jnp.float32)
    sa_out = sa_out.at[:, :, :6].set(flags)
    se_out = jax.random.normal(kse, (T, 5, 5), jnp.float32)
    cluster = jax.random.normal(kc, (total,), jnp.float32)
    pedestrian_index = [1, 3, 7]
    vehicle_index = [2, 4, 5, 6, 8]
    rider_index = []

    outs = risk_interaction_forward(params, cluster, a, start, end, sa_out, se_out,
                                    pedestrian_index, vehicle_index, rider_index)
    risk_inter_out, scene_graph_a, scene_graph_e, node_ou_64 = outs
    jax.tree_util.tree_map(jax.block_until_ready, outs)

    assert risk_inter_out.shape == (T, N, N)
    assert scene_graph_a.shape == (T, N + M, 2)
    assert scene_graph_e.shape == (T, N + M, N + M)
    assert node_ou_64.shape == (T, N, 64)
    assert bool(jnp.all(jnp.isfinite(risk_inter_out)))
    assert bool(jnp.all(jnp.isfinite(node_ou_64)))
    # diagonal is masked out (i == j) and first timestep is duplicated.
    diag = jnp.diagonal(risk_inter_out, axis1=1, axis2=2)
    assert bool(jnp.all(diag == 0.0))
    assert bool(jnp.all(risk_inter_out[0] == risk_inter_out[1]))
    print("KERNEL_OK")
</pallas_src>

<mosaic_0001>
module attributes {stable_mosaic.version = 11 : i64} {
  func.func @fused_step_kernel(%arg0: i32, %arg1: memref<1x8x6xf32, #tpu.memory_space<vmem>>, %arg2: memref<1x6x8xf32, #tpu.memory_space<vmem>>, %arg3: memref<1x32x1xf32, #tpu.memory_space<vmem>>, %arg4: memref<8x1xf32, #tpu.memory_space<vmem>>, %arg5: memref<8x8xf32, #tpu.memory_space<vmem>>, %arg6: memref<22x128xf32, #tpu.memory_space<vmem>>, %arg7: memref<256x128xbf16, #tpu.memory_space<vmem>>, %arg8: memref<64x128xbf16, #tpu.memory_space<vmem>>, %arg9: memref<1x8x128xf32, #tpu.memory_space<vmem>>) attributes {dimension_semantics = [#tpu.dimension_semantics<parallel>], iteration_bounds = array<i64: 5>, scalar_prefetch = 0 : i64, scratch_operands = 0 : i64, tpu.core_type = #tpu.core_type<tc>, window_params = [{transform_indices = @transform_0, window_bounds = array<i64: 1, 8, 6>}, {transform_indices = @transform_1, window_bounds = array<i64: 1, 6, 8>}, {transform_indices = @transform_2, window_bounds = array<i64: 1, 32, 1>}, {pipeline_mode = #tpu.pipeline_mode<synchronous>, transform_indices = @transform_3, window_bounds = array<i64: 8, 1>}, {pipeline_mode = #tpu.pipeline_mode<synchronous>, transform_indices = @transform_4, window_bounds = array<i64: 8, 8>}, {pipeline_mode = #tpu.pipeline_mode<synchronous>, transform_indices = @transform_5, window_bounds = array<i64: 22, 128>}, {pipeline_mode = #tpu.pipeline_mode<synchronous>, transform_indices = @transform_6, window_bounds = array<i64: 256, 128>}, {pipeline_mode = #tpu.pipeline_mode<synchronous>, transform_indices = @transform_7, window_bounds = array<i64: 64, 128>}, {transform_indices = @transform_8, window_bounds = array<i64: 1, 8, 128>}]} {
    %c0 = arith.constant 0 : index
    %c0_0 = arith.constant 0 : index
    %0 = vector.load %arg6[%c0, %c0_0] : memref<22x128xf32, #tpu.memory_space<vmem>>, vector<22x128xf32>
    %1 = vector.extract_strided_slice %0 {offsets = [0, 0], sizes = [1, 128], strides = [1, 1]} : vector<22x128xf32> to vector<1x128xf32>
    %2 = vector.extract_strided_slice %0 {offsets = [1, 0], sizes = [1, 128], strides = [1, 1]} : vector<22x128xf32> to vector<1x128xf32>
    %3 = vector.extract_strided_slice %0 {offsets = [2, 0], sizes = [4, 128], strides = [1, 1]} : vector<22x128xf32> to vector<4x128xf32>
    %4 = vector.extract_strided_slice %0 {offsets = [6, 0], sizes = [1, 128], strides = [1, 1]} : vector<22x128xf32> to vector<1x128xf32>
    %5 = vector.extract_strided_slice %0 {offsets = [7, 0], sizes = [4, 128], strides = [1, 1]} : vector<22x128xf32> to vector<4x128xf32>
    %6 = vector.extract_strided_slice %0 {offsets = [11, 0], sizes = [1, 128], strides = [1, 1]} : vector<22x128xf32> to vector<1x128xf32>
    %7 = vector.extract_strided_slice %0 {offsets = [12, 0], sizes = [4, 128], strides = [1, 1]} : vector<22x128xf32> to vector<4x128xf32>
    %8 = vector.extract_strided_slice %0 {offsets = [16, 0], sizes = [1, 128], strides = [1, 1]} : vector<22x128xf32> to vector<1x128xf32>
    %9 = vector.extract_strided_slice %0 {offsets = [17, 0], sizes = [1, 64], strides = [1, 1]} : vector<22x128xf32> to vector<1x64xf32>
    %10 = vector.extract_strided_slice %0 {offsets = [17, 64], sizes = [1, 64], strides = [1, 1]} : vector<22x128xf32> to vector<1x64xf32>
    %11 = vector.extract_strided_slice %0 {offsets = [18, 0], sizes = [1, 64], strides = [1, 1]} : vector<22x128xf32> to vector<1x64xf32>
    %12 = vector.extract_strided_slice %0 {offsets = [18, 64], sizes = [1, 64], strides = [1, 1]} : vector<22x128xf32> to vector<1x64xf32>
    %13 = vector.extract_strided_slice %0 {offsets = [19, 0], sizes = [1, 1], strides = [1, 1]} : vector<22x128xf32> to vector<1x1xf32>
    %14 = vector.extract_strided_slice %0 {offsets = [19, 1], sizes = [1, 1], strides = [1, 1]} : vector<22x128xf32> to vector<1x1xf32>
    %15 = vector.extract_strided_slice %0 {offsets = [19, 2], sizes = [1, 1], strides = [1, 1]} : vector<22x128xf32> to vector<1x1xf32>
    %16 = vector.extract_strided_slice %0 {offsets = [20, 0], sizes = [1, 64], strides = [1, 1]} : vector<22x128xf32> to vector<1x64xf32>
    %17 = vector.extract_strided_slice %0 {offsets = [21, 0], sizes = [1, 64], strides = [1, 1]} : vector<22x128xf32> to vector<1x64xf32>
    %c0_1 = arith.constant 0 : index
    %c0_2 = arith.constant 0 : index
    %18 = vector.load %arg7[%c0_1, %c0_2] : memref<256x128xbf16, #tpu.memory_space<vmem>>, vector<256x128xbf16>
    %19 = vector.extract_strided_slice %18 {offsets = [0, 0], sizes = [128, 128], strides = [1, 1]} : vector<256x128xbf16> to vector<128x128xbf16>
    %20 = vector.extract_strided_slice %18 {offsets = [128, 0], sizes = [128, 128], strides = [1, 1]} : vector<256x128xbf16> to vector<128x128xbf16>
    %c0_3 = arith.constant 0 : index
    %c0_4 = arith.constant 0 : index
    %21 = vector.load %arg8[%c0_3, %c0_4] : memref<64x128xbf16, #tpu.memory_space<vmem>>, vector<64x128xbf16>
    %c0_5 = arith.constant 0 : index
    %c0_6 = arith.constant 0 : index
    %c0_7 = arith.constant 0 : index
    %22 = vector.load %arg3[%c0_5, %c0_6, %c0_7] : memref<1x32x1xf32, #tpu.memory_space<vmem>>, vector<1x32x1xf32>
    %23 = vector.shape_cast %22 : vector<1x32x1xf32> to vector<32x1xf32>
    %24 = vector.broadcast %23 : vector<32x1xf32> to vector<32x128xf32>
    %25 = vector.broadcast %1 : vector<1x128xf32> to vector<32x128xf32>
    %26 = arith.mulf %24, %25 : vector<32x128xf32>
    %27 = vector.broadcast %2 : vector<1x128xf32> to vector<32x128xf32>
    %28 = arith.addf %26, %27 : vector<32x128xf32>
    %cst = arith.constant 0.000000e+00 : f32
    %29 = vector.broadcast %cst : f32 to vector<32x128xf32>
    %30 = arith.cmpf oge, %28, %29 : vector<32x128xf32>
    %cst_8 = arith.constant 2.500000e-01 : f32
    %31 = vector.broadcast %cst_8 : f32 to vector<32x128xf32>
    %32 = arith.mulf %31, %28 : vector<32x128xf32>
    %33 = arith.select %30, %28, %32 : vector<32x128xi1>, vector<32x128xf32>
    %34 = arith.truncf %33 : vector<32x128xf32> to vector<32x128xbf16>
    %cst_9 = arith.constant dense<0.000000e+00> : vector<32x128xf32>
    %35 = tpu.matmul %34, %19, %cst_9 {dimension_numbers = #tpu.dot_dimension_numbers<[1], [0], [0], [1], [0, 0, 1, 1], [], []>} : vector<32x128xbf16>, vector<128x128xbf16>, vector<32x128xf32> -> vector<32x128xf32>
    %36 = vector.extract_strided_slice %35 {offsets = [0, 0], sizes = [32, 64], strides = [1, 1]} : vector<32x128xf32> to vector<32x64xf32>
    %37 = vector.broadcast %9 : vector<1x64xf32> to vector<32x64xf32>
    %38 = arith.addf %36, %37 : vector<32x64xf32>
    %cst_10 = arith.constant 0.000000e+00 : f32
    %39 = vector.broadcast %cst_10 : f32 to vector<32x64xf32>
    %40 = arith.cmpf oge, %38, %39 : vector<32x64xf32>
    %cst_11 = arith.constant 2.500000e-01 : f32
    %41 = vector.broadcast %cst_11 : f32 to vector<32x64xf32>
    %42 = arith.mulf %41, %38 : vector<32x64xf32>
    %43 = arith.select %40, %38, %42 : vector<32x64xi1>, vector<32x64xf32>
    %44 = arith.truncf %43 : vector<32x64xf32> to vector<32x64xbf16>
    %cst_12 = arith.constant dense<0.000000e+00> : vector<32x128xf32>
    %45 = tpu.matmul %44, %21, %cst_12 {dimension_numbers = #tpu.dot_dimension_numbers<[1], [0], [0], [1], [0, 0, 1, 1], [], []>} : vector<32x64xbf16>, vector<64x128xbf16>, vector<32x128xf32> -> vector<32x128xf32>
    %46 = vector.extract_strided_slice %45 {offsets = [0, 0], sizes = [32, 1], strides = [1, 1]} : vector<32x128xf32> to vector<32x1xf32>
    %47 = vector.broadcast %13 : vector<1x1xf32> to vector<32x1xf32>
    %48 = arith.addf %46, %47 : vector<32x1xf32>
    %cst_13 = arith.constant 0.000000e+00 : f32
    %49 = vector.broadcast %cst_13 : f32 to vector<32x1xf32>
    %50 = arith.cmpf oge, %48, %49 : vector<32x1xf32>
    %cst_14 = arith.constant 2.500000e-01 : f32
    %51 = vector.broadcast %cst_14 : f32 to vector<32x1xf32>
    %52 = arith.mulf %51, %48 : vector<32x1xf32>
    %53 = arith.select %50, %48, %52 : vector<32x1xi1>, vector<32x1xf32>
    %54 = vector.extract_strided_slice %53 {offsets = [0, 0], sizes = [8, 1], strides = [1, 1]} : vector<32x1xf32> to vector<8x1xf32>
    %55 = vector.extract_strided_slice %53 {offsets = [8, 0], sizes = [8, 1], strides = [1, 1]} : vector<32x1xf32> to vector<8x1xf32>
    %56 = vector.extract_strided_slice %53 {offsets = [16, 0], sizes = [8, 1], strides = [1, 1]} : vector<32x1xf32> to vector<8x1xf32>
    %57 = vector.extract_strided_slice %53 {offsets = [24, 0], sizes = [8, 1], strides = [1, 1]} : vector<32x1xf32> to vector<8x1xf32>
    %58 = vector.extract_strided_slice %3 {offsets = [0, 0], sizes = [1, 128], strides = [1, 1]} : vector<4x128xf32> to vector<1x128xf32>
    %59 = vector.broadcast %54 : vector<8x1xf32> to vector<8x128xf32>
    %60 = vector.broadcast %58 : vector<1x128xf32> to vector<8x128xf32>
    %61 = arith.mulf %59, %60 : vector<8x128xf32>
    %62 = vector.extract_strided_slice %3 {offsets = [1, 0], sizes = [1, 128], strides = [1, 1]} : vector<4x128xf32> to vector<1x128xf32>
    %63 = vector.broadcast %55 : vector<8x1xf32> to vector<8x128xf32>
    %64 = vector.broadcast %62 : vector<1x128xf32> to vector<8x128xf32>
    %65 = arith.mulf %63, %64 : vector<8x128xf32>
    %66 = arith.addf %61, %65 : vector<8x128xf32>
    %67 = vector.extract_strided_slice %3 {offsets = [2, 0], sizes = [1, 128], strides = [1, 1]} : vector<4x128xf32> to vector<1x128xf32>
    %68 = vector.broadcast %56 : vector<8x1xf32> to vector<8x128xf32>
    %69 = vector.broadcast %67 : vector<1x128xf32> to vector<8x128xf32>
    %70 = arith.mulf %68, %69 : vector<8x128xf32>
    %71 = arith.addf %66, %70 : vector<8x128xf32>
    %72 = vector.extract_strided_slice %3 {offsets = [3, 0], sizes = [1, 128], strides = [1, 1]} : vector<4x128xf32> to vector<1x128xf32>
    %73 = vector.broadcast %57 : vector<8x1xf32> to vector<8x128xf32>
    %74 = vector.broadcast %72 : vector<1x128xf32> to vector<8x128xf32>
    %75 = arith.mulf %73, %74 : vector<8x128xf32>
    %76 = arith.addf %71, %75 : vector<8x128xf32>
    %77 = vector.broadcast %4 : vector<1x128xf32> to vector<8x128xf32>
    %78 = arith.addf %76, %77 : vector<8x128xf32>
    %cst_15 = arith.constant 0.000000e+00 : f32
    %79 = vector.broadcast %cst_15 : f32 to vector<8x128xf32>
    %80 = arith.cmpf oge, %78, %79 : vector<8x128xf32>
    %cst_16 = arith.constant 2.500000e-01 : f32
    %81 = vector.broadcast %cst_16 : f32 to vector<8x128xf32>
    %82 = arith.mulf %81, %78 : vector<8x128xf32>
    %83 = arith.select %80, %78, %82 : vector<8x128xi1>, vector<8x128xf32>
    %84 = arith.truncf %83 : vector<8x128xf32> to vector<8x128xbf16>
    %cst_17 = arith.constant dense<0.000000e+00> : vector<8x128xf32>
    %85 = tpu.matmul %84, %19, %cst_17 {dimension_numbers = #tpu.dot_dimension_numbers<[1], [0], [0], [1], [0, 0, 1, 1], [], []>} : vector<8x128xbf16>, vector<128x128xbf16>, vector<8x128xf32> -> vector<8x128xf32>
    %86 = vector.extract_strided_slice %85 {offsets = [0, 64], sizes = [8, 64], strides = [1, 1]} : vector<8x128xf32> to vector<8x64xf32>
    %87 = vector.broadcast %10 : vector<1x64xf32> to vector<8x64xf32>
    %88 = arith.addf %86, %87 : vector<8x64xf32>
    %cst_18 = arith.constant 0.000000e+00 : f32
    %89 = vector.broadcast %cst_18 : f32 to vector<8x64xf32>
    %90 = arith.cmpf oge, %88, %89 : vector<8x64xf32>
    %cst_19 = arith.constant 2.500000e-01 : f32
    %91 = vector.broadcast %cst_19 : f32 to vector<8x64xf32>
    %92 = arith.mulf %91, %88 : vector<8x64xf32>
    %93 = arith.select %90, %88, %92 : vector<8x64xi1>, vector<8x64xf32>
    %94 = arith.truncf %93 : vector<8x64xf32> to vector<8x64xbf16>
    %cst_20 = arith.constant dense<0.000000e+00> : vector<8x128xf32>
    %95 = tpu.matmul %94, %21, %cst_20 {dimension_numbers = #tpu.dot_dimension_numbers<[1], [0], [0], [1], [0, 0, 1, 1], [], []>} : vector<8x64xbf16>, vector<64x128xbf16>, vector<8x128xf32> -> vector<8x128xf32>
    %96 = vector.extract_strided_slice %95 {offsets = [0, 1], sizes = [8, 1], strides = [1, 1]} : vector<8x128xf32> to vector<8x1xf32>
    %97 = vector.broadcast %14 : vector<1x1xf32> to vector<8x1xf32>
    %98 = arith.addf %96, %97 : vector<8x1xf32>
    %cst_21 = arith.constant 0.000000e+00 : f32
    %99 = vector.broadcast %cst_21 : f32 to vector<8x1xf32>
    %100 = arith.cmpf oge, %98, %99 : vector<8x1xf32>
    %cst_22 = arith.constant 2.500000e-01 : f32
    %101 = vector.broadcast %cst_22 : f32 to vector<8x1xf32>
    %102 = arith.mulf %101, %98 : vector<8x1xf32>
    %103 = arith.select %100, %98, %102 : vector<8x1xi1>, vector<8x1xf32>
    %104 = vector.extract_strided_slice %5 {offsets = [0, 0], sizes = [1, 128], strides = [1, 1]} : vector<4x128xf32> to vector<1x128xf32>
    %105 = vector.broadcast %54 : vector<8x1xf32> to vector<8x128xf32>
    %106 = vector.broadcast %104 : vector<1x128xf32> to vector<8x128xf32>
    %107 = arith.mulf %105, %106 : vector<8x128xf32>
    %108 = vector.extract_strided_slice %5 {offsets = [1, 0], sizes = [1, 128], strides = [1, 1]} : vector<4x128xf32> to vector<1x128xf32>
    %109 = vector.broadcast %55 : vector<8x1xf32> to vector<8x128xf32>
    %110 = vector.broadcast %108 : vector<1x128xf32> to vector<8x128xf32>
    %111 = arith.mulf %109, %110 : vector<8x128xf32>
    %112 = arith.addf %107, %111 : vector<8x128xf32>
    %113 = vector.extract_strided_slice %5 {offsets = [2, 0], sizes = [1, 128], strides = [1, 1]} : vector<4x128xf32> to vector<1x128xf32>
    %114 = vector.broadcast %56 : vector<8x1xf32> to vector<8x128xf32>
    %115 = vector.broadcast %113 : vector<1x128xf32> to vector<8x128xf32>
    %116 = arith.mulf %114, %115 : vector<8x128xf32>
    %117 = arith.addf %112, %116 : vector<8x128xf32>
    %118 = vector.extract_strided_slice %5 {offsets = [3, 0], sizes = [1, 128], strides = [1, 1]} : vector<4x128xf32> to vector<1x128xf32>
    %119 = vector.broadcast %57 : vector<8x1xf32> to vector<8x128xf32>
    %120 = vector.broadcast %118 : vector<1x128xf32> to vector<8x128xf32>
    %121 = arith.mulf %119, %120 : vector<8x128xf32>
    %122 = arith.addf %117, %121 : vector<8x128xf32>
    %123 = vector.broadcast %6 : vector<1x128xf32> to vector<8x128xf32>
    %124 = arith.addf %122, %123 : vector<8x128xf32>
    %cst_23 = arith.constant 0.000000e+00 : f32
    %125 = vector.broadcast %cst_23 : f32 to vector<8x128xf32>
    %126 = arith.cmpf oge, %124, %125 : vector<8x128xf32>
    %cst_24 = arith.constant 2.500000e-01 : f32
    %127 = vector.broadcast %cst_24 : f32 to vector<8x128xf32>
    %128 = arith.mulf %127, %124 : vector<8x128xf32>
    %129 = arith.select %126, %124, %128 : vector<8x128xi1>, vector<8x128xf32>
    %130 = arith.truncf %129 : vector<8x128xf32> to vector<8x128xbf16>
    %cst_25 = arith.constant dense<0.000000e+00> : vector<8x128xf32>
    %131 = tpu.matmul %130, %20, %cst_25 {dimension_numbers = #tpu.dot_dimension_numbers<[1], [0], [0], [1], [0, 0, 1, 1], [], []>} : vector<8x128xbf16>, vector<128x128xbf16>, vector<8x128xf32> -> vector<8x128xf32>
    %132 = vector.extract_strided_slice %131 {offsets = [0, 0], sizes = [8, 64], strides = [1, 1]} : vector<8x128xf32> to vector<8x64xf32>
    %133 = vector.broadcast %11 : vector<1x64xf32> to vector<8x64xf32>
    %134 = arith.addf %132, %133 : vector<8x64xf32>
    %cst_26 = arith.constant 0.000000e+00 : f32
    %135 = vector.broadcast %cst_26 : f32 to vector<8x64xf32>
    %136 = arith.cmpf oge, %134, %135 : vector<8x64xf32>
    %cst_27 = arith.constant 2.500000e-01 : f32
    %137 = vector.broadcast %cst_27 : f32 to vector<8x64xf32>
    %138 = arith.mulf %137, %134 : vector<8x64xf32>
    %139 = arith.select %136, %134, %138 : vector<8x64xi1>, vector<8x64xf32>
    %140 = arith.truncf %139 : vector<8x64xf32> to vector<8x64xbf16>
    %cst_28 = arith.constant dense<0.000000e+00> : vector<8x128xf32>
    %141 = tpu.matmul %140, %21, %cst_28 {dimension_numbers = #tpu.dot_dimension_numbers<[1], [0], [0], [1], [0, 0, 1, 1], [], []>} : vector<8x64xbf16>, vector<64x128xbf16>, vector<8x128xf32> -> vector<8x128xf32>
    %142 = vector.extract_strided_slice %141 {offsets = [0, 64], sizes = [8, 64], strides = [1, 1]} : vector<8x128xf32> to vector<8x64xf32>
    %143 = vector.broadcast %16 : vector<1x64xf32> to vector<8x64xf32>
    %144 = arith.addf %142, %143 : vector<8x64xf32>
    %cst_29 = arith.constant 0.000000e+00 : f32
    %145 = vector.broadcast %cst_29 : f32 to vector<8x64xf32>
    %146 = arith.cmpf oge, %144, %145 : vector<8x64xf32>
    %cst_30 = arith.constant 2.500000e-01 : f32
    %147 = vector.broadcast %cst_30 : f32 to vector<8x64xf32>
    %148 = arith.mulf %147, %144 : vector<8x64xf32>
    %149 = arith.select %146, %144, %148 : vector<8x64xi1>, vector<8x64xf32>
    %c0_31 = arith.constant 0 : index
    %c0_32 = arith.constant 0 : index
    %c0_33 = arith.constant 0 : index
    %150 = vector.load %arg1[%c0_31, %c0_32, %c0_33] : memref<1x8x6xf32, #tpu.memory_space<vmem>>, vector<1x8x6xf32>
    %151 = vector.shape_cast %150 : vector<1x8x6xf32> to vector<8x6xf32>
    %c0_34 = arith.constant 0 : index
    %c0_35 = arith.constant 0 : index
    %c0_36 = arith.constant 0 : index
    %152 = vector.load %arg2[%c0_34, %c0_35, %c0_36] : memref<1x6x8xf32, #tpu.memory_space<vmem>>, vector<1x6x8xf32>
    %153 = vector.shape_cast %152 : vector<1x6x8xf32> to vector<6x8xf32>
    %154 = vector.extract_strided_slice %151 {offsets = [0, 0], sizes = [8, 1], strides = [1, 1]} : vector<8x6xf32> to vector<8x1xf32>
    %155 = vector.extract_strided_slice %151 {offsets = [0, 1], sizes = [8, 1], strides = [1, 1]} : vector<8x6xf32> to vector<8x1xf32>
    %156 = vector.extract_strided_slice %151 {offsets = [0, 2], sizes = [8, 1], strides = [1, 1]} : vector<8x6xf32> to vector<8x1xf32>
    %157 = vector.extract_strided_slice %151 {offsets = [0, 4], sizes = [8, 1], strides = [1, 1]} : vector<8x6xf32> to vector<8x1xf32>
    %158 = vector.extract_strided_slice %151 {offsets = [0, 5], sizes = [8, 1], strides = [1, 1]} : vector<8x6xf32> to vector<8x1xf32>
    %159 = vector.extract_strided_slice %153 {offsets = [0, 0], sizes = [1, 8], strides = [1, 1]} : vector<6x8xf32> to vector<1x8xf32>
    %160 = vector.extract_strided_slice %153 {offsets = [1, 0], sizes = [1, 8], strides = [1, 1]} : vector<6x8xf32> to vector<1x8xf32>
    %161 = vector.extract_strided_slice %153 {offsets = [2, 0], sizes = [1, 8], strides = [1, 1]} : vector<6x8xf32> to vector<1x8xf32>
    %162 = vector.extract_strided_slice %153 {offsets = [4, 0], sizes = [1, 8], strides = [1, 1]} : vector<6x8xf32> to vector<1x8xf32>
    %163 = vector.extract_strided_slice %153 {offsets = [5, 0], sizes = [1, 8], strides = [1, 1]} : vector<6x8xf32> to vector<1x8xf32>
    %164 = vector.broadcast %159 : vector<1x8xf32> to vector<8x8xf32>
    %165 = vector.broadcast %154 : vector<8x1xf32> to vector<8x8xf32>
    %166 = arith.subf %164, %165 : vector<8x8xf32>
    %167 = vector.broadcast %160 : vector<1x8xf32> to vector<8x8xf32>
    %168 = vector.broadcast %155 : vector<8x1xf32> to vector<8x8xf32>
    %169 = arith.subf %167, %168 : vector<8x8xf32>
    %170 = arith.mulf %166, %166 : vector<8x8xf32>
    %171 = arith.mulf %169, %169 : vector<8x8xf32>
    %172 = arith.addf %170, %171 : vector<8x8xf32>
    %cst_37 = arith.constant 0.000000e+00 : f32
    %173 = vector.broadcast %cst_37 : f32 to vector<8x8xf32>
    %174 = arith.cmpf ogt, %172, %173 : vector<8x8xf32>
    %175 = arith.extui %174 : vector<8x8xi1> to vector<8x8xi32>
    %176 = arith.sitofp %175 : vector<8x8xi32> to vector<8x8xf32>
    %cst_38 = arith.constant 0.000000e+00 : f32
    %177 = vector.broadcast %cst_38 : f32 to vector<8x8xf32>
    %178 = arith.cmpf ogt, %172, %177 : vector<8x8xf32>
    %cst_39 = arith.constant 1.000000e+00 : f32
    %179 = vector.broadcast %cst_39 : f32 to vector<8x8xf32>
    %180 = arith.select %178, %172, %179 : vector<8x8xi1>, vector<8x8xf32>
    %181 = math.rsqrt %180 : vector<8x8xf32>
    %182 = arith.mulf %181, %176 : vector<8x8xf32>
    %183 = math.absf %166 : vector<8x8xf32>
    %184 = arith.mulf %183, %182 : vector<8x8xf32>
    %cst_40 = arith.constant 0.000000e+00 : f32
    %185 = vector.broadcast %cst_40 : f32 to vector<8x8xf32>
    %186 = arith.cmpf oeq, %166, %185 : vector<8x8xf32>
    %cst_41 = arith.constant 0.000000e+00 : f32
    %187 = vector.broadcast %cst_41 : f32 to vector<8x8xf32>
    %188 = arith.cmpf oge, %166, %187 : vector<8x8xf32>
    %cst_42 = arith.constant 1.000000e+00 : f32
    %cst_43 = arith.constant -1.000000e+00 : f32
    %189 = vector.broadcast %cst_42 : f32 to vector<8x8xf32>
    %190 = vector.broadcast %cst_43 : f32 to vector<8x8xf32>
    %191 = arith.select %188, %189, %190 : vector<8x8xi1>, vector<8x8xf32>
    %192 = arith.mulf %191, %169 : vector<8x8xf32>
    %193 = arith.mulf %192, %182 : vector<8x8xf32>
    %cst_44 = arith.constant 1.000000e+00 : f32
    %194 = vector.broadcast %cst_44 : f32 to vector<8x8xf32>
    %195 = arith.select %186, %194, %193 : vector<8x8xi1>, vector<8x8xf32>
    %196 = vector.broadcast %157 : vector<8x1xf32> to vector<8x8xf32>
    %197 = arith.mulf %196, %184 : vector<8x8xf32>
    %198 = vector.broadcast %158 : vector<8x1xf32> to vector<8x8xf32>
    %199 = arith.mulf %198, %195 : vector<8x8xf32>
    %200 = arith.addf %197, %199 : vector<8x8xf32>
    %201 = vector.broadcast %162 : vector<1x8xf32> to vector<8x8xf32>
    %202 = arith.mulf %201, %184 : vector<8x8xf32>
    %203 = vector.broadcast %163 : vector<1x8xf32> to vector<8x8xf32>
    %204 = arith.mulf %203, %195 : vector<8x8xf32>
    %205 = arith.addf %202, %204 : vector<8x8xf32>
    %cst_45 = arith.constant 0.000000e+00 : f32
    %206 = vector.broadcast %cst_45 : f32 to vector<8x8xf32>
    %207 = arith.cmpf ogt, %200, %206 : vector<8x8xf32>
    %208 = arith.extui %207 : vector<8x8xi1> to vector<8x8xi32>
    %209 = arith.sitofp %208 : vector<8x8xi32> to vector<8x8xf32>
    %210 = vector.broadcast %156 : vector<8x1xf32> to vector<8x8xf32>
    %211 = arith.mulf %210, %200 : vector<8x8xf32>
    %212 = vector.broadcast %161 : vector<1x8xf32> to vector<8x8xf32>
    %213 = arith.mulf %212, %205 : vector<8x8xf32>
    %214 = arith.subf %211, %213 : vector<8x8xf32>
    %215 = math.absf %214 : vector<8x8xf32>
    %216 = arith.mulf %215, %182 : vector<8x8xf32>
    %217 = arith.mulf %216, %209 : vector<8x8xf32>
    %c0_46 = arith.constant 0 : index
    %c0_47 = arith.constant 0 : index
    %218 = vector.load %arg5[%c0_46, %c0_47] : memref<8x8xf32, #tpu.memory_space<vmem>>, vector<8x8xf32>
    %219 = arith.mulf %217, %218 : vector<8x8xf32>
    %c0_48 = arith.constant 0 : index
    %c0_49 = arith.constant 0 : index
    %220 = vector.load %arg4[%c0_48, %c0_49] : memref<8x1xf32, #tpu.memory_space<vmem>>, vector<8x1xf32>
    %221 = vector.extract_strided_slice %7 {offsets = [0, 0], sizes = [1, 128], strides = [1, 1]} : vector<4x128xf32> to vector<1x128xf32>
    %222 = vector.broadcast %103 : vector<8x1xf32> to vector<8x128xf32>
    %223 = vector.broadcast %221 : vector<1x128xf32> to vector<8x128xf32>
    %224 = arith.mulf %222, %223 : vector<8x128xf32>
    %225 = vector.extract_strided_slice %7 {offsets = [2, 0], sizes = [1, 128], strides = [1, 1]} : vector<4x128xf32> to vector<1x128xf32>
    %226 = vector.broadcast %220 : vector<8x1xf32> to vector<8x128xf32>
    %227 = vector.broadcast %225 : vector<1x128xf32> to vector<8x128xf32>
    %228 = arith.mulf %226, %227 : vector<8x128xf32>
    %229 = arith.addf %224, %228 : vector<8x128xf32>
    %230 = vector.broadcast %8 : vector<1x128xf32> to vector<8x128xf32>
    %231 = arith.addf %229, %230 : vector<8x128xf32>
    %232 = vector.extract_strided_slice %7 {offsets = [1, 0], sizes = [1, 128], strides = [1, 1]} : vector<4x128xf32> to vector<1x128xf32>
    %233 = vector.broadcast %103 : vector<8x1xf32> to vector<8x128xf32>
    %234 = vector.broadcast %232 : vector<1x128xf32> to vector<8x128xf32>
    %235 = arith.mulf %233, %234 : vector<8x128xf32>
    %236 = vector.extract_strided_slice %7 {offsets = [3, 0], sizes = [1, 128], strides = [1, 1]} : vector<4x128xf32> to vector<1x128xf32>
    %237 = vector.broadcast %220 : vector<8x1xf32> to vector<8x128xf32>
    %238 = vector.broadcast %236 : vector<1x128xf32> to vector<8x128xf32>
    %239 = arith.mulf %237, %238 : vector<8x128xf32>
    %240 = arith.addf %235, %239 : vector<8x128xf32>
    %241 = vector.shape_cast %231 : vector<8x128xf32> to vector<8x1x128xf32>
    %242 = vector.shape_cast %241 : vector<8x1x128xf32> to vector<8x1x128xf32>
    %243 = vector.broadcast %242 : vector<8x1x128xf32> to vector<8x8x128xf32>
    %244 = vector.shape_cast %240 : vector<8x128xf32> to vector<1x8x128xf32>
    %245 = vector.shape_cast %244 : vector<1x8x128xf32> to vector<1x8x128xf32>
    %246 = vector.broadcast %245 : vector<1x8x128xf32> to vector<8x8x128xf32>
    %247 = arith.addf %243, %246 : vector<8x8x128xf32>
    %cst_50 = arith.constant 0.000000e+00 : f32
    %248 = vector.broadcast %cst_50 : f32 to vector<8x8x128xf32>
    %249 = arith.cmpf oge, %247, %248 : vector<8x8x128xf32>
    %cst_51 = arith.constant 2.500000e-01 : f32
    %250 = vector.broadcast %cst_51 : f32 to vector<8x8x128xf32>
    %251 = arith.mulf %250, %247 : vector<8x8x128xf32>
    %252 = arith.select %249, %247, %251 : vector<8x8x128xi1>, vector<8x8x128xf32>
    %253 = vector.shape_cast %252 : vector<8x8x128xf32> to vector<64x128xf32>
    %254 = arith.truncf %253 : vector<64x128xf32> to vector<64x128xbf16>
    %cst_52 = arith.constant dense<0.000000e+00> : vector<64x128xf32>
    %255 = tpu.matmul %254, %20, %cst_52 {dimension_numbers = #tpu.dot_dimension_numbers<[1], [0], [0], [1], [0, 0, 1, 1], [], []>} : vector<64x128xbf16>, vector<128x128xbf16>, vector<64x128xf32> -> vector<64x128xf32>
    %256 = vector.extract_strided_slice %255 {offsets = [0, 64], sizes = [64, 64], strides = [1, 1]} : vector<64x128xf32> to vector<64x64xf32>
    %257 = vector.broadcast %12 : vector<1x64xf32> to vector<64x64xf32>
    %258 = arith.addf %256, %257 : vector<64x64xf32>
    %cst_53 = arith.constant 0.000000e+00 : f32
    %259 = vector.broadcast %cst_53 : f32 to vector<64x64xf32>
    %260 = arith.cmpf oge, %258, %259 : vector<64x64xf32>
    %cst_54 = arith.constant 2.500000e-01 : f32
    %261 = vector.broadcast %cst_54 : f32 to vector<64x64xf32>
    %262 = arith.mulf %261, %258 : vector<64x64xf32>
    %263 = arith.select %260, %258, %262 : vector<64x64xi1>, vector<64x64xf32>
    %264 = vector.shape_cast %263 : vector<64x64xf32> to vector<8x8x64xf32>
    %265 = vector.shape_cast %17 : vector<1x64xf32> to vector<1x1x64xf32>
    %266 = vector.broadcast %265 : vector<1x1x64xf32> to vector<8x8x64xf32>
    %267 = arith.mulf %264, %266 : vector<8x8x64xf32>
    %cst_55 = arith.constant dense<0.000000e+00> : vector<8x8xf32>
    %268 = vector.multi_reduction <add>, %267, %cst_55 [2] : vector<8x8x64xf32> to vector<8x8xf32>
    %269 = vector.broadcast %15 : vector<1x1xf32> to vector<8x8xf32>
    %270 = arith.addf %268, %269 : vector<8x8xf32>
    %cst_56 = arith.constant 0.000000e+00 : f32
    %271 = vector.broadcast %cst_56 : f32 to vector<8x8xf32>
    %272 = arith.cmpf oge, %270, %271 : vector<8x8xf32>
    %cst_57 = arith.constant 2.500000e-01 : f32
    %273 = vector.broadcast %cst_57 : f32 to vector<8x8xf32>
    %274 = arith.mulf %273, %270 : vector<8x8xf32>
    %275 = arith.select %272, %270, %274 : vector<8x8xi1>, vector<8x8xf32>
    %c0_58 = arith.constant 0 : index
    %c0_59 = arith.constant 0 : index
    %c0_60 = arith.constant 0 : index
    %276 = vector.load %arg9[%c0_58, %c0_59, %c0_60] : memref<1x8x128xf32, #tpu.memory_space<vmem>>, vector<1x8x64xf32>
    %277 = vector.shape_cast %276 : vector<1x8x64xf32> to vector<8x64xf32>
    %278 = vector.shape_cast %149 : vector<8x64xf32> to vector<1x8x64xf32>
    tpu.vector_store %arg9[%c0_58, %c0_59, %c0_60], %278 {strides = array<i32>} : memref<1x8x128xf32, #tpu.memory_space<vmem>>, vector<1x8x64xf32>,
    %279 = arith.mulf %219, %275 : vector<8x8xf32>
    %c0_61 = arith.constant 0 : index
    %c0_62 = arith.constant 0 : index
    %c64 = arith.constant 64 : index
    %280 = vector.load %arg9[%c0_61, %c0_62, %c64] : memref<1x8x128xf32, #tpu.memory_space<vmem>>, vector<1x8x8xf32>
    %281 = vector.shape_cast %280 : vector<1x8x8xf32> to vector<8x8xf32>
    %282 = vector.shape_cast %279 : vector<8x8xf32> to vector<1x8x8xf32>
    tpu.vector_store %arg9[%c0_61, %c0_62, %c64], %282 {strides = array<i32>} : memref<1x8x128xf32, #tpu.memory_space<vmem>>, vector<1x8x8xf32>,
    %cst_63 = arith.constant 0.000000e+00 : f32
    %283 = vector.broadcast %cst_63 : f32 to vector<8x56xf32>
    %c0_64 = arith.constant 0 : index
    %c0_65 = arith.constant 0 : index
    %c72 = arith.constant 72 : index
    %284 = vector.load %arg9[%c0_64, %c0_65, %c72] : memref<1x8x128xf32, #tpu.memory_space<vmem>>, vector<1x8x56xf32>
    %285 = vector.shape_cast %284 : vector<1x8x56xf32> to vector<8x56xf32>
    %286 = vector.shape_cast %283 : vector<8x56xf32> to vector<1x8x56xf32>
    tpu.vector_store %arg9[%c0_64, %c0_65, %c72], %286 {strides = array<i32>} : memref<1x8x128xf32, #tpu.memory_space<vmem>>, vector<1x8x56xf32>,
    return
  }
  func.func @transform_0(%arg0: i32) -> (i32, i32, i32) {
    %c0_i32 = arith.constant 0 : i32
    %c0_i32_0 = arith.constant 0 : i32
    %c0_i32_1 = arith.constant 0 : i32
    return %arg0, %c0_i32, %c0_i32_0 : i32, i32, i32
  }
  func.func @transform_1(%arg0: i32) -> (i32, i32, i32) {
    %c0_i32 = arith.constant 0 : i32
    %c0_i32_0 = arith.constant 0 : i32
    %c0_i32_1 = arith.constant 0 : i32
    return %arg0, %c0_i32, %c0_i32_0 : i32, i32, i32
  }
  func.func @transform_2(%arg0: i32) -> (i32, i32, i32) {
    %c0_i32 = arith.constant 0 : i32
    %c0_i32_0 = arith.constant 0 : i32
    %c0_i32_1 = arith.constant 0 : i32
    return %arg0, %c0_i32, %c0_i32_0 : i32, i32, i32
  }
  func.func @transform_3(%arg0: i32) -> (i32, i32) {
    %c0_i32 = arith.constant 0 : i32
    %c0_i32_0 = arith.constant 0 : i32
    %c0_i32_1 = arith.constant 0 : i32
    return %c0_i32, %c0_i32_0 : i32, i32
  }
  func.func @transform_4(%arg0: i32) -> (i32, i32) {
    %c0_i32 = arith.constant 0 : i32
    %c0_i32_0 = arith.constant 0 : i32
    %c0_i32_1 = arith.constant 0 : i32
    return %c0_i32, %c0_i32_0 : i32, i32
  }
  func.func @transform_5(%arg0: i32) -> (i32, i32) {
    %c0_i32 = arith.constant 0 : i32
    %c0_i32_0 = arith.constant 0 : i32
    %c0_i32_1 = arith.constant 0 : i32
    return %c0_i32, %c0_i32_0 : i32, i32
  }
  func.func @transform_6(%arg0: i32) -> (i32, i32) {
    %c0_i32 = arith.constant 0 : i32
    %c0_i32_0 = arith.constant 0 : i32
    %c0_i32_1 = arith.constant 0 : i32
    return %c0_i32, %c0_i32_0 : i32, i32
  }
  func.func @transform_7(%arg0: i32) -> (i32, i32) {
    %c0_i32 = arith.constant 0 : i32
    %c0_i32_0 = arith.constant 0 : i32
    %c0_i32_1 = arith.constant 0 : i32
    return %c0_i32, %c0_i32_0 : i32, i32
  }
  func.func @transform_8(%arg0: i32) -> (i32, i32, i32) {
    %c0_i32 = arith.constant 0 : i32
    %c0_i32_0 = arith.constant 0 : i32
    %c0_i32_1 = arith.constant 0 : i32
    return %arg0, %c0_i32, %c0_i32_0 : i32, i32, i32
  }
}

</mosaic_0001>

<bundles_post_ra>
// kernel: tpu_custom_call.1
= control target key start
LH: loop header
LB: loop body
LE: loop exit
PB: predicated region body
PF: predicated region fallthrough
CT: control target
= control target key end

     0   :  { %13 = vsyncpa [#allocation3], 0  ;;  %s2818_s0 = inlined_call_operand.vmem [shape: f32[5,8,6], index: 0, kind: input, shape index: {}]   ;;  %s2819_s1 = inlined_call_operand.hbm [shape: f32[5,6,8], index: 1, kind: input, shape index: {}]   ;;  %s2820_s2 = inlined_call_operand.vmem [shape: f32[5,32,1], index: 2, kind: input, shape index: {}]   ;;  %s2821_s3 = inlined_call_operand.vmem [shape: f32[8,1], index: 3, kind: input, shape index: {}]   ;;  %s2822_s4 = inlined_call_operand.hbm [shape: f32[8,8], index: 4, kind: input, shape index: {}]   ;;  %s2823_s5 = inlined_call_operand.hbm [shape: f32[22,128], index: 5, kind: input, shape index: {}]   ;;  %s2824_s6 = inlined_call_operand.vmem [shape: bf16[256,128], index: 6, kind: input, shape index: {}]   ;;  %s2825_s7 = inlined_call_operand.vmem [shape: bf16[64,128], index: 7, kind: input, shape index: {}]   ;;  %s2826_s8 = inlined_call_operand.hbm [shape: f32[5,8,128], index: 8, kind: output, shape index: {}]  }
   0x1   :  { %15 = vsyncpa [#allocation3 + $0x1], 0 }
   0x2   :  { %16 = vsyncpa [#allocation6], 0 }
   0x3   :  { %17 = vsyncpa [#allocation4], 0 }
   0x4   :  { %19 = vsyncpa [#allocation4 + $0x1], 0  ;;  %s2237_s27 = smov 0   ;;  %s2239_s28 = smov 0  }
   0x5   :  { %s2241_s29 = smov 0   ;;  %s2243_s30 = smov 0  }
   0x6 LB: > { %s2258_s9 = sadd.s32 4294967295, %s2173_s30   ;;  %s1682_s10 = sadd.s32 4294967294, %s2173_s30   ;;  %s2173_s30 = sphi %s2243_s30, %s2845_s30   ;;  %s2169_s29 = sphi %s2241_s29, %s2844_s29   ;;  %s2165_s28 = sphi %s2239_s28, %s2843_s28   ;;  %s2161_s27 = sphi %s2237_s27, %s2842_s27  }
   0x7   : > { %p71_p0 = scmp.ne.s32.totalorder %s2165_s28, %s2161_s27  ;;  %p2827_p1 = scmp.eq.s32.totalorder %s2258_s9, 0 }
   0x8   : > { %p232_p3 = scmp.eq.s32.totalorder %s1682_s10, 4  ;;  %p1683_p5 = scmp.ge.s32.totalorder %s2173_s30, 1 }
   0x9   : > { %p2267_p4 = por %p2827_p1, %p71_p0  ;;  %p239_p7 = scmp.lt.s32.totalorder %s2173_s30, 6 }
   0xa   : > { %p2272_p6 = por %p232_p3, %p71_p0  ;;  %s2175_s14 = smov [#allocation5]  }
   0xb   : > { %s2830_s11 = scalar_select %p2267_p4, 1, 0 }
   0xc   : > { %s2831_s12 = scalar_select %p2272_p6, 1, 0 }
   0xd   : > { %p2277_p8 = pnand %p1683_p5, %p239_p7  ;;  %s255_s15 = sshll.u32 %s2175_s14, 4  ;;  %s256_s15 = int_to_ptr.vmem [resolvable:$true] %s255_s15 }
   0xe   : > { %s2176_s16 = smov [#allocation7]   ;;  %s2017_s21 = scalar_lea.hbm %s2822_s4, 128 }
   0xf   : > { %s2832_s13 = scalar_select %p2277_p8, 1, 0 }
  0x10   : > { %p1918_p9 = pneg %p2277_p8  ;;  %s265_s17 = sshll.u32 %s2176_s16, 4  ;;  %s2289_s17 = int_to_ptr.vmem [resolvable:$true] %s265_s17 }
  0x11   : > { %p2018_p11 = scmp.ne.s32.totalorder %s2822_s4, %s2017_s21  ;;  %p2024_p3 = scmp.lt.u32.totalorder %s2017_s21, %s2822_s4 }
  0x12   : > { %p2285_p10 = pnand %p1918_p9, %p2827_p1 }
  0x14   : > { %p2019_p12 = pneg %p2285_p10 }
  0x16   : > { %p2020_p13 = pnand %p2019_p12, %p2018_p11 }
  0x18   : > { %p2021_p0 = pneg %p2020_p13 }
  0x1a   : > { %p2026_p5 = pnand %p2024_p3, %p2021_p0 }
  0x1c   : > { %2029 = shalt.err (!%p2026_p5)
}
  0x1d   : > { %s2030_s26 = scalar_lea.vmem %s256_s15, 128  ;;  %p2038_p2 = scmp.lt.s32.totalorder %s256_s15, %s256_s15 }
  0x1e   : > { %p2031_p7 = scmp.ne.s32.totalorder %s256_s15, %s2030_s26  ;;  %p2039_p6 = scmp.lt.s32.totalorder %s2030_s26, %s2030_s26 }
  0x20   : > { %p2033_p9 = pnand %p2031_p7, %p2019_p12  ;;  %p2040_p4 = por %p2039_p6, %p2038_p2 }
  0x22   : > { %p2034_p1 = pneg %p2033_p9 }
  0x24   : > { %p2041_p8 = pnand %p2040_p4, %p2034_p1 }
  0x26   : > { %2044 = shalt.err (!%p2041_p8)
}
  0x27   : > { %1921 = dma.hbm_to_vmem [thread:$0]  (!%p2285_p10), %s2822_s4, 128, %s256_s15, [#allocation6]  }
  0x28   : > { %s2045_s20 = scalar_lea.hbm %s2823_s5, 384 }
  0x29   : > { %p2046_p11 = scmp.ne.s32.totalorder %s2823_s5, %s2045_s20  ;;  %p2052_p4 = scmp.lt.u32.totalorder %s2045_s20, %s2823_s5 }
  0x2b   : > { %p2048_p2 = pnand %p2046_p11, %p2019_p12 }
  0x2d   : > { %p2049_p1 = pneg %p2048_p2 }
  0x2f   : > { %p2054_p6 = pnand %p2052_p4, %p2049_p1 }
  0x31   : > { %2057 = shalt.err (!%p2054_p6)
}
  0x32   : > { %s2058_s15 = scalar_lea.vmem %s2289_s17, 384  ;;  %p2066_p3 = scmp.lt.s32.totalorder %s2289_s17, %s2289_s17 }
  0x33   : > { %p2059_p8 = scmp.ne.s32.totalorder %s2289_s17, %s2058_s15  ;;  %p2067_p5 = scmp.lt.s32.totalorder %s2058_s15, %s2058_s15 }
  0x35   : > { %p2061_p13 = pnand %p2059_p8, %p2019_p12  ;;  %p2068_p7 = por %p2067_p5, %p2066_p3 }
  0x37   : > { %p2062_p0 = pneg %p2061_p13 }
  0x39   : > { %p2069_p9 = pnand %p2068_p7, %p2062_p0 }
  0x3b   : > { %2072 = shalt.err (!%p2069_p9)
}
  0x3c   : > { %s2177_s25 = smov 128   ;;  %s2178_s26 = smov 8  }
  0x3d   : > { %1924 = dma.hbm_to_vmem [thread:$0]  (!%p2285_p10), %s2823_s5, 384, %s2289_s17, [#allocation6], %s2177_s25, %s2177_s25, %s2178_s26  }
  0x3e   : > { %s2339_s16 = sadd.s32 1, %s2173_s30   ;;  %s58_s19 = sadd.s32 1, %s2169_s29 }
  0x3f   : > { %s55_s20 = ssub.s32 %s2173_s30, %s2339_s16  ;;  %p65_p12 = scmp.ne.s32.totalorder %s2169_s29, %s2165_s28 }
  0x40   : > { %p56_p11 = scmp.eq.s32.totalorder %s55_s20, 0  ;;  %p66_p2 = scmp.eq.s32.totalorder %s2173_s30, 0 }
  0x41   : > { %p2834_p1 = scmp.eq.s32.totalorder %s2258_s9, 4  ;;  %p1935_p6 = scmp.lt.s32.totalorder %s2173_s30, 5 }
  0x42   : > { %s2355_s22 = scalar_select %p56_p11, %s2169_s29, %s58_s19  }
  0x43   : > { %p2349_p4 = por %p2834_p1, %p65_p12  ;;  %p67_p8 = por %p66_p2, %p65_p12 }
  0x44   : > { %s292_s18 = sand.u32 1, %s2169_s29   ;;  %s1688_s17 = sshll.u32 %s2173_s30, 7 }
  0x45   : > { %s1687_s23 = sshll.u32 %s292_s18, 3  ;;  %s2362_s25 = scalar_lea.hbm %s2819_s1, %s1688_s17 }
  0x46   : > { %s296_s26 = scalar_lea.vmem [#allocation2], %s1687_s23  ;;  %p2366_p10 = pnand %p1935_p6, %p67_p8 }
  0x47   : > { %s303_s10 = sshll.u32 %s296_s26, 4  ;;  %s293_s19 = scalar_lea.sflag [#allocation3], %s292_s18  ;;  %s2364_s10 = int_to_ptr.vmem [resolvable:$true] %s303_s10 }
  0x48   : > { %s2073_s20 = scalar_lea.hbm %s2362_s25, 128  ;;  %p2075_p0 = pneg %p2366_p10 }
  0x49   : > { %p2074_p13 = scmp.ne.s32.totalorder %s2362_s25, %s2073_s20  ;;  %s2078_s24 = scalar_lea.hbm %s2819_s1, 640 }
  0x4a   : > { %p2079_p7 = scmp.lt.u32.totalorder %s2362_s25, %s2819_s1  ;;  %p2080_p9 = scmp.lt.u32.totalorder %s2078_s24, %s2073_s20 }
  0x4b   : > { %p2076_p3 = pnand %p2075_p0, %p2074_p13  ;;  %p2082_p11 = scmp.lt.u32.totalorder %s2073_s20, %s2362_s25 }
  0x4c   : > { %p2081_p12 = por %p2080_p9, %p2079_p7 }
  0x4d   : > { %p2077_p5 = pneg %p2076_p3 }
  0x4e   : > { %p2083_p2 = por %p2082_p11, %p2081_p12 }
  0x50   : > { %p2084_p1 = pnand %p2083_p2, %p2077_p5 }
  0x52   : > { %2087 = shalt.err (!%p2084_p1)
}
  0x53   : > { %s2088_s18 = scalar_lea.vmem %s2364_s10, 128  ;;  %s2179_s17 = smov [#allocation2]  }
  0x54   : > { %p2089_p6 = scmp.ne.s32.totalorder %s2364_s10, %s2088_s18  ;;  %s2093_s23 = sshll.u32 %s2179_s17, 4  ;;  %s2094_s23 = int_to_ptr.vmem [resolvable:$false] %s2093_s23 }
  0x55   : > { %s2095_s15 = scalar_lea.vmem %s2094_s23, 256  ;;  %p2096_p3 = scmp.lt.s32.totalorder %s2364_s10, %s2094_s23 }
  0x56   : > { %p2091_p8 = pnand %p2089_p6, %p2075_p0  ;;  %p2097_p7 = scmp.lt.s32.totalorder %s2095_s15, %s2088_s18 }
  0x58   : > { %p2092_p13 = pneg %p2091_p8  ;;  %p2098_p9 = por %p2097_p7, %p2096_p3 }
  0x5a   : > { %p2099_p12 = pnand %p2098_p9, %p2092_p13 }
  0x5c   : > { %2102 = shalt.err (!%p2099_p12)
}
  0x5d   : > { %1928 = dma.hbm_to_vmem [thread:$0]  (!%p2366_p10), %s2362_s25, 128, %s2364_s10, %s293_s19  }
  0x5e   : > { %p2837_p5 = scmp.ne.s32.totalorder %s2832_s13, 0 }
  0x5f   : > { %s2398_s20 = sand.u32 (!%p2837_p5), 1, %s2165_s28   ;;  %p2838_p0 = scmp.ne.s32.totalorder (!%p2837_p5), %s2830_s11, 0 }
  0x60   : > { %320 = sbr.rel (%p2837_p5) target bundleno = 2196 (0x894), region = 52  ;;  %s1690_s24 = sshll.u32 (!%p2837_p5), %s2398_s20, 3 }
  0x61   : > { %s323_s26 = scalar_lea.sflag (!%p2837_p5), [#allocation3], %s2398_s20  ;;  %s2404_s18 = scalar_lea.vmem (!%p2837_p5), [#allocation2], %s1690_s24 }
  0x67   : > { %2148 = dma.done.wait (%p2838_p0), %s323_s26, 128  }
  0x68   : > { %2150 = vsyncadd (%p2838_p0), %s323_s26, 4294967168  ;;  %p2839_p10 = scmp.eq.s32.totalorder %s2258_s9, 0 }
  0x6a   : > { %2152 = dma.done.wait (%p2839_p10), [#allocation6], 512   ;;  %p2840_p11 = pmov %p2839_p10 }
  0x6b   : > { %p376_p2 = scmp.lt.s32.totalorder %s2258_s9, 4  ;;  %v2180_v0 = vmov 0   ;;  %v2427_v5 = vld [vmem:[%s2824_s6] sm:$0xff]   ;;  %v2432_v6 = vld [vmem:[%s2824_s6 + $0x8] sm:$0xff]   ;;  %v2440_v7 = vld [vmem:[%s2824_s6 + $0x10] sm:$0xff]   ;;  %v453_v14 = vlaneseq  ;;  %vm626_vm8 = vcmask 523264  }
  0x6c   : > { %2154 = vsyncadd (%p2840_p11), [#allocation6], 4294966784  ;;  %1987 = vset.pattern.permute.xlu1 %v2180_v0  ;;  %1986 = vset.pattern.permute.xlu0 %v2180_v0  ;;  %v2445_v8 = vld [vmem:[%s2824_s6 + $0x18] sm:$0xff]   ;;  %v2454_v9 = vld [vmem:[%s2824_s6 + $0x20] sm:$0xff]   ;;  %vm2182_vm13 = vmmov 0   ;;  %s375_s26 = scalar_lea.vmem [#allocation8], %s1690_s24 }
  0x6d   : > { %s2418_s13 = scalar_select %p376_p2, %s2258_s9, 4  ;;  %1784 = vmatprep.subr.bf16.mxu0 %v2427_v5  ;;  %v2461_v10 = vld [vmem:[%s2824_s6 + $0x28] sm:$0xff]   ;;  %v2468_v11 = vld [vmem:[%s2824_s6 + $0x30] sm:$0xff]   ;;  %v2475_v12 = vld [vmem:[%s2824_s6 + $0x38] sm:$0xff]   ;;  %v2487_v15 = vshrl.u32 %v453_v14, 7 }
  0x6e   : > { %1785 = vmatpush3.bf16.msra.mxu0 %v2427_v5  ;;  %v2482_v13 = vld [vmem:[%s2825_s7] sm:$0xff]   ;;  %v2492_v17 = vld [vmem:[#allocation7] sm:$0xff]  ;;  %v2505_v43 = vld [vmem:[%s2825_s7 + $0x8] sm:$0xff]   ;;  %s1569_s11 = sshll.u32 %s375_s26, 4  ;;  %s1556_s24 = scalar_lea.sflag [#allocation4], %s2398_s20  ;;  %s2776_s11 = int_to_ptr.vmem [resolvable:$true] %s1569_s11 }
  0x6f   : > { %s1727_s25 = sshll.u32 %s2418_s13, 5  ;;  %1786 = vmatprep.subr.bf16.mxu0 %v2432_v6  ;;  %v2490_v16 = vsub.s32 0, %v2487_v15  ;;  %v2495_v18 = vsub.s32 1, %v2487_v15  ;;  %v2512_v44 = vld [vmem:[%s2825_s7 + $0x10] sm:$0xff]   ;;  %v2519_v45 = vld [vmem:[%s2825_s7 + $0x18] sm:$0xff]   ;;  %s1694_s19 = sshll.u32 %s2418_s13, 3 }
  0x70   : > { %s384_s14 = scalar_lea.vmem %s2820_s2, %s1727_s25  ;;  %v2523_v46 = vld [vmem:[#allocation7 + $0x10] sm:$0x3f]  ;;  %s379_s15 = scalar_lea.vmem %s2818_s0, %s1694_s19 }
  0x71   : > { %v431_v1 = vld [vmem:[%s384_s14 + $0x10] sm:$0xff]  ;;  %v429_v2 = vld [vmem:[%s384_s14] sm:$0xff]  ;;  %v432_v3 = vld [vmem:[%s384_s14 + $0x18] sm:$0xff]  ;;  %v456_v19 = vrot.slane %v2492_v17, %v2490_v16  ;;  %v464_v20 = vrot.slane %v2492_v17, %v2495_v18  ;;  %v2527_v47 = vrot.slane %v2523_v46, %v2495_v18  ;;  %s2186_s13 = smov 126   ;;  %s1724_s25 = sshll.u32 %s2258_s9, 7 }
  0x72   : > { %445 = vperm.xlu1 %1987, %v431_v1   ;;  %435 = vperm.xlu0 %1986, %v429_v2   ;;  %v430_v4 = vld [vmem:[%s384_s14 + $0x8] sm:$0xff]  ;;  %s2183_s14 = smov 64   ;;  %s2774_s17 = scalar_lea.hbm %s2826_s8, %s1724_s25 }
  0x73   : > { %1787 = vmatpush3.bf16.msra.mxu0 %v2432_v6  ;;  %s2191_s9 = smov [#allocation8]  }
  0x74   : > { %1788 = vmatprep.subr.bf16.mxu0 %v2440_v7  ;;  %s2107_s23 = sshll.u32 %s2191_s9, 4  ;;  %s2108_s23 = int_to_ptr.vmem [resolvable:$false] %s2107_s23 }
  0x75   : > { %p2110_p13 = scmp.lt.s32.totalorder %s2776_s11, %s2108_s23 }
  0x76   : > { %450 = vperm.xlu1 %1987, %v432_v3   ;;  %440 = vperm.xlu0 %1986, %v430_v4   ;;  %v2181_v3 = vmov 0.0   ;;  %v2562_v4 = vsub.s32 3, %v2487_v15 }
  0x77   : > { %1789 = vmatpush3.bf16.msra.mxu0 %v2440_v7  ;;  %1816 = vmatprep.subr.bf16.mxu1 %v2181_v3 }
  0x78   : > { %1790 = vmatprep.subr.bf16.mxu0 %v2445_v8  ;;  %1817 = vmatpush3.bf16.msra.mxu1 %v2427_v5  ;;  %v2566_v5 = vrot.slane %v2523_v46, %v2562_v4 }
  0x79   : > { %1818 = vmatprep.subr.bf16.mxu1 %v2181_v3  ;;  %1832 = vmatprep.mubr.msk.bf16.mxu1 %vm2182_vm13, %v2181_v3 }
  0x7b   : > { %1791 = vmatpush3.bf16.msra.mxu0 %v2445_v8 }
  0x7c   : > { %1792 = vmatprep.subr.bf16.mxu0 %v2454_v9  ;;  %1819 = vmatpush3.bf16.msra.mxu1 %v2432_v6 }
  0x7d   : > { %1820 = vmatprep.subr.bf16.mxu1 %v2181_v3 }
  0x7f   : > { %1793 = vmatpush3.bf16.msra.mxu0 %v2454_v9 }
  0x80   : > { %1794 = vmatprep.subr.bf16.mxu0 %v2461_v10  ;;  %1821 = vmatpush3.bf16.msra.mxu1 %v2440_v7 }
  0x81   : > { %1822 = vmatprep.subr.bf16.mxu1 %v2181_v3 }
  0x83   : > { %1795 = vmatpush3.bf16.msra.mxu0 %v2461_v10 }
  0x84   : > { %1796 = vmatprep.subr.bf16.mxu0 %v2468_v11  ;;  %1823 = vmatpush3.bf16.msra.mxu1 %v2445_v8 }
  0x85   : > { %1824 = vmatprep.subr.bf16.mxu1 %v2181_v3 }
  0x87   : > { %1797 = vmatpush3.bf16.msra.mxu0 %v2468_v11 }
  0x88   : > { %1798 = vmatprep.subr.bf16.mxu0 %v2475_v12  ;;  %1825 = vmatpush3.bf16.msra.mxu1 %v2454_v9 }
  0x89   : > { %1826 = vmatprep.subr.bf16.mxu1 %v2181_v3 }
  0x8b   : > { %1799 = vmatpush3.bf16.msra.mxu0 %v2475_v12 }
  0x8c   : > { %1804 = vmatprep.subr.bf16.mxu0 %v2482_v13  ;;  %1827 = vmatpush3.bf16.msra.mxu1 %v2461_v10 }
  0x8d   : > { %1828 = vmatprep.subr.bf16.mxu1 %v2181_v3 }
  0x90   : > { %1829 = vmatpush3.bf16.msra.mxu1 %v2468_v11 }
  0x91   : > { %1830 = vmatprep.subr.bf16.mxu1 %v2181_v3 }
  0x94   : > { %1831 = vmatpush3.bf16.msra.mxu1 %v2475_v12 }
  0x95   : > { %1868 = vmatprep.subr.bf16.mxu1 %v2181_v3 }
  0xf1   : > { %v446_v21 = vpop.permute.xlu1 %445  ;;  %v436_v22 = vpop.permute.xlu0 %435 }
  0xf2   : > { %v459_v23 = vmul.f32 %v456_v19, %v446_v21  ;;  %v457_v24 = vmul.f32 %v456_v19, %v436_v22 }
  0xf4   : > { %v467_v25 = vadd.f32 %v464_v20, %v459_v23  ;;  %v465_v26 = vadd.f32 %v464_v20, %v457_v24 }
  0xf5   : > { %v451_v27 = vpop.permute.xlu1 %450  ;;  %v441_v28 = vpop.permute.xlu0 %440 }
  0xf6   : > { %v460_v29 = vmul.f32 %v456_v19, %v451_v27  ;;  %v458_v30 = vmul.f32 %v456_v19, %v441_v28  ;;  %v475_v31 = vmul.f32 0.25, %v467_v25  ;;  %v473_v34 = vmul.f32 0.25, %v465_v26 }
  0xf7   : > { %vm471_vm0 = vcmp.ge.f32.partialorder %v467_v25, 0.0  ;;  %vm469_vm1 = vcmp.ge.f32.partialorder %v465_v26, 0.0  ;;  %v2577_v28 = vsub.s32 2, %v2487_v15 }
  0xf8   : > { %v468_v32 = vadd.f32 %v464_v20, %v460_v29  ;;  %v466_v33 = vadd.f32 %v464_v20, %v458_v30  ;;  %v477_v37 = vsel %vm469_vm1, %v465_v26, %v473_v34  ;;  %v479_v39 = vsel %vm471_vm0, %v467_v25, %v475_v31  ;;  %v2580_v30 = vld [vmem:[#allocation7 + $0x8] sm:$0xff] }
  0xf9   : > { %v851_v29 = vsub.s32 7, %v2487_v15  ;;  %v2583_v31 = vsub.s32 4, %v2487_v15 }
  0xfa   : > { %vm472_vm2 = vcmp.ge.f32.partialorder %v468_v32, 0.0  ;;  %v476_v35 = vmul.f32 0.25, %v468_v32  ;;  %vm470_vm3 = vcmp.ge.f32.partialorder %v466_v33, 0.0  ;;  %v474_v36 = vmul.f32 0.25, %v466_v33 }
  0xfb   : > { %v852_v34 = vrot.slane %v2492_v17, %v851_v29 }
  0xfc   : > { %v478_v38 = vsel %vm470_vm3, %v466_v33, %v474_v36  ;;  %v480_v40 = vsel %vm472_vm2, %v468_v32, %v476_v35  ;;  %v2586_v32 = vsub.s32 5, %v2487_v15  ;;  %v710_v33 = vrot.slane %v2492_v17, %v2577_v28 }
  0xfd   : > { %v481_v41 = vpack.c.bf16 %v478_v38, %v477_v37  ;;  %v482_v42 = vpack.c.bf16 %v480_v40, %v479_v39  ;;  %v720_v35 = vrot.slane %v2492_v17, %v2562_v4  ;;  %v857_v36 = vrot.slane %v2580_v30, %v2490_v16 }
  0xfe   : > { %v731_v38 = vrot.slane %v2492_v17, %v2583_v31  ;;  %v742_v40 = vrot.slane %v2492_v17, %v2586_v32 }
  0xff   : > { %1800 = vmatprep.mubr.bf16.mxu0 %v481_v41  ;;  %v747_v41 = vsub.s32 6, %v2487_v15 }
 0x100   : > { %1801 = vmatmul.mubr.bf16.vlgmr.msra.gmra.mrb[0].mxu0 %v482_v42 }
 0x101   : > { %1805 = vmatpush3.bf16.msra.mxu0 %v2482_v13 }
 0x102   : > { %1806 = vmatprep.subr.bf16.mxu0 %v2505_v43 }
 0x105   : > { %1807 = vmatpush3.bf16.msra.mxu0 %v2505_v43 }
 0x106   : > { %1808 = vmatprep.subr.bf16.mxu0 %v2512_v44 }
 0x109   : > { %1809 = vmatpush3.bf16.msra.mxu0 %v2512_v44 }
 0x10a   : > { %1810 = vmatprep.subr.bf16.mxu0 %v2519_v45 }
 0x10d   : > { %1811 = vmatpush3.bf16.msra.mxu0 %v2519_v45 }
 0x10e   : > { %1836 = vmatprep.subr.bf16.mxu0 %v2181_v3 }
 0x1d3   : > { %v1802_v48 = vpop.f32.mrb[0].mxu0 }
 0x1d4   : > { %v586_v49 = vadd.f32 %v1802_v48, %v2527_v47  ;;  %v565_v50 = vpop.f32.mrb[1].mxu0 }
 0x1d5   : > { %v584_v51 = vadd.f32 %v2527_v47, %v565_v50  ;;  %v1803_v52 = vpop.f32.mrb[2].mxu0 }
 0x1d6   : > { %v594_v53 = vmul.f32 0.25, %v586_v49  ;;  %v587_v54 = vadd.f32 %v1803_v52, %v2527_v47  ;;  %v568_v55 = vpop.f32.mrb[3].mxu0  ;;  %vm590_vm4 = vcmp.ge.f32.partialorder %v586_v49, 0.0 }
 0x1d7   : > { %v592_v56 = vmul.f32 0.25, %v584_v51  ;;  %v585_v57 = vadd.f32 %v2527_v47, %v568_v55  ;;  %vm588_vm5 = vcmp.ge.f32.partialorder %v584_v51, 0.0 }
 0x1d8   : > { %vm591_vm6 = vcmp.ge.f32.partialorder %v587_v54, 0.0  ;;  %v595_v58 = vmul.f32 0.25, %v587_v54  ;;  %v598_v60 = vsel %vm590_vm4, %v586_v49, %v594_v53 }
 0x1d9   : > { %vm589_vm7 = vcmp.ge.f32.partialorder %v585_v57, 0.0  ;;  %v593_v59 = vmul.f32 0.25, %v585_v57  ;;  %v596_v62 = vsel %vm588_vm5, %v584_v51, %v592_v56 }
 0x1da   : > { %v599_v61 = vsel %vm591_vm6, %v587_v54, %v595_v58 }
 0x1db   : > { %v601_v63 = vpack.c.bf16 %v599_v61, %v598_v60  ;;  %v597_v1 = vsel %vm589_vm7, %v585_v57, %v593_v59  ;;  %v748_v57 = vrot.slane %v2492_v17, %v747_v41  ;;  %v2617_v17 = vld [vmem:[%s2824_s6 + $0x40] sm:$0xff]  }
 0x1dc   : > { %v600_v2 = vpack.c.bf16 %v597_v1, %v596_v62 }
 0x1de   : > { %1812 = vmatprep.mubr.msk.bf16.mxu0 %vm626_vm8, %v600_v2 }
 0x1df   : > { %1813 = vmatmul.mubr.msk.bf16.vlgmr.msra.gmra.mrb[4].mxu0 %vm626_vm8, %v601_v63 }
 0x1e0   : > { %1837 = vmatpush3.bf16.msra.mxu0 %v2482_v13  ;;  %1844 = vmatprep.mubr.msk.bf16.mxu0 %vm2182_vm13, %v2181_v3 }
 0x1e1   : > { %1838 = vmatprep.subr.bf16.mxu0 %v2181_v3 }
 0x1e4   : > { %1839 = vmatpush3.bf16.msra.mxu0 %v2505_v43 }
 0x1e5   : > { %1840 = vmatprep.subr.bf16.mxu0 %v2181_v3 }
 0x1e8   : > { %1841 = vmatpush3.bf16.msra.mxu0 %v2512_v44 }
 0x1e9   : > { %1842 = vmatprep.subr.bf16.mxu0 %v2181_v3 }
 0x1ec   : > { %1843 = vmatpush3.bf16.msra.mxu0 %v2519_v45 }
 0x1ed   : > { %1848 = vmatprep.subr.bf16.mxu0 %v2181_v3 }
 0x2b2   : > { %v1814_v6 = vpop.f32.mrb[4].mxu0 }
 0x2b3   : > { %v667_v7 = vpop.f32.mrb[5].mxu0  ;;  %v688_v8 = vadd.f32 %v1814_v6, %v2566_v5 }
 0x2b4   : > { %v686_v9 = vadd.f32 %v2566_v5, %v667_v7  ;;  %v1815_v10 = vpop.f32.mrb[6].mxu0 }
 0x2b5   : > { %v670_v11 = vpop.f32.mrb[7].mxu0  ;;  %v689_v12 = vadd.f32 %v1815_v10, %v2566_v5  ;;  %v696_v21 = vmul.f32 0.25, %v688_v8  ;;  %vm692_vm11 = vcmp.ge.f32.partialorder %v688_v8, 0.0  ;;  %v863_v10 = vrot.slane %v2580_v30, %v2495_v18 }
 0x2b6   : > { %v694_v19 = vmul.f32 0.25, %v686_v9  ;;  %v687_v20 = vadd.f32 %v2566_v5, %v670_v11  ;;  %vm690_vm9 = vcmp.ge.f32.partialorder %v686_v9, 0.0  ;;  %v2009_v11 = vld [vmem:[%s2824_s6 + $0x50] sm:$0xff]  }
 0x2b7   : > { %v697_v24 = vmul.f32 0.25, %v689_v12  ;;  %vm693_vm12 = vcmp.ge.f32.partialorder %v689_v12, 0.0  ;;  %v700_v26 = vsel %vm692_vm11, %v688_v8, %v696_v21 }
 0x2b8   : > { %v695_v22 = vmul.f32 0.25, %v687_v20  ;;  %v698_v23 = vsel %vm690_vm9, %v686_v9, %v694_v19  ;;  %vm691_vm10 = vcmp.ge.f32.partialorder %v687_v20, 0.0 }
 0x2b9   : > { %704 = vperm.xlu0 %1986, %v698_v23   ;;  %v701_v27 = vsel %vm693_vm12, %v689_v12, %v697_v24  ;;  %v869_v12 = vrot.slane %v2580_v30, %v2577_v28  ;;  %v2011_v23 = vld [vmem:[%s2824_s6 + $0x60] sm:$0xff]   ;;  %v875_v24 = vrot.slane %v2580_v30, %v2562_v4  ;;  %v2014_v4 = vld [vmem:[%s2824_s6 + $0x78] sm:$0xff]  }
 0x2ba   : > { %v699_v25 = vsel %vm691_vm10, %v687_v20, %v695_v22  ;;  %v2010_v20 = vld [vmem:[%s2824_s6 + $0x58] sm:$0xff]  }
 0x2bb   : > { %714 = vperm.xlu1 %1987, %v699_v25  }
 0x2bd   : > { %725 = vperm.xlu0 %1986, %v700_v26   ;;  %v2012_v26 = vld [vmem:[%s2824_s6 + $0x68] sm:$0xff]  }
 0x2bf   : > { %736 = vperm.xlu1 %1987, %v701_v27  }
 0x338   : > { %v705_v37 = vpop.permute.xlu0 %704 }
 0x339   : > { %v711_v42 = vmul.f32 %v710_v33, %v705_v37  ;;  %v853_v48 = vmul.f32 %v852_v34, %v705_v37  ;;  %v2013_v33 = vld [vmem:[%s2824_s6 + $0x70] sm:$0xff]   ;;  %v2184_v37 = vmov 1  }
 0x33a   : > { %v715_v39 = vpop.permute.xlu1 %714  ;;  %1988 = vset.pattern.permute.xlu1 %v2184_v37 }
 0x33b   : > { %v721_v49 = vmul.f32 %v720_v35, %v715_v39  ;;  %v858_v50 = vmul.f32 %v857_v36, %v715_v39 }
 0x33c   : > { %v726_v51 = vpop.permute.xlu0 %725 }
 0x33d   : > { %v722_v52 = vadd.f32 %v721_v49, %v711_v42  ;;  %v859_v53 = vadd.f32 %v858_v50, %v853_v48  ;;  %v732_v54 = vmul.f32 %v731_v38, %v726_v51  ;;  %v864_v19 = vmul.f32 %v863_v10, %v726_v51 }
 0x33e   : > { %v737_v55 = vpop.permute.xlu1 %736  ;;  %v2667_v51 = vrot.slane %v2523_v46, %v2577_v28 }
 0x33f   : > { %v733_v56 = vadd.f32 %v732_v54, %v722_v52  ;;  %v743_v58 = vmul.f32 %v742_v40, %v737_v55  ;;  %v865_v21 = vadd.f32 %v864_v19, %v859_v53  ;;  %v870_v22 = vmul.f32 %v869_v12, %v737_v55 }
 0x341   : > { %v744_v59 = vadd.f32 %v743_v58, %v733_v56  ;;  %v871_v25 = vadd.f32 %v870_v22, %v865_v21 }
 0x343   : > { %v749_v60 = vadd.f32 %v748_v57, %v744_v59  ;;  %v876_v27 = vadd.f32 %v875_v24, %v871_v25  ;;  %v1376_v59 = vrot.slane %v2523_v46, %v2586_v32 }
 0x345   : > { %vm750_vm14 = vcmp.ge.f32.partialorder %v749_v60, 0.0  ;;  %v751_v61 = vmul.f32 0.25, %v749_v60  ;;  %v878_v34 = vmul.f32 0.25, %v876_v27  ;;  %vm877_vm0 = vcmp.ge.f32.partialorder %v876_v27, 0.0 }
 0x347   : > { %v752_v62 = vsel %vm750_vm14, %v749_v60, %v751_v61  ;;  %v879_v35 = vsel %vm877_vm0, %v876_v27, %v878_v34  ;;  %v2185_v60 = vmov 1966171168  }
 0x348   : > { %v753_v63 = vpack.c.bf16 %v752_v62, %v752_v62  ;;  %v880_v36 = vpack.c.bf16 %v879_v35, %v879_v35  ;;  %v1153_v61 = vunpack.c.l.s4 %v2185_v60  ;;  %v2679_v62 = vld [vmem:[%s379_s15] sm:$0xff]  ;;  %s2109_s15 = scalar_lea.vmem %s2108_s23, 256 }
 0x34a   : > { %1833 = vmatmul.mubr.bf16.vlgmr.msra.gmra.mrb[0].mxu1 %v753_v63  ;;  %v1131_v63 = vrot.slane %v2580_v30, %v747_v41 }
 0x34b   : > { %1869 = vmatpush3.bf16.msra.mxu1 %v2482_v13  ;;  %1876 = vmatprep.mubr.msk.bf16.mxu1 %vm2182_vm13, %v2181_v3 }
 0x34c   : > { %1870 = vmatprep.subr.bf16.mxu1 %v2181_v3 }
 0x34f   : > { %1871 = vmatpush3.bf16.msra.mxu1 %v2505_v43 }
 0x350   : > { %1872 = vmatprep.subr.bf16.mxu1 %v2181_v3 }
 0x353   : > { %1873 = vmatpush3.bf16.msra.mxu1 %v2512_v44 }
 0x354   : > { %1874 = vmatprep.subr.bf16.mxu1 %v2181_v3 }
 0x357   : > { %1875 = vmatpush3.bf16.msra.mxu1 %v2519_v45  ;;  %v1112_v45 = vld [vmem:[%s2821_s3] sm:$0xff] }
 0x358   : > { %1880 = vmatprep.subr.bf16.mxu1 %v2617_v17 }
 0x41d   : > { %v788_v13 = vpop.f32.mrb[0].mxu1 }
 0x41e   : > { %v794_v1 = vadd.f32 %v788_v13, %v2527_v47  ;;  %v1834_v2 = vpop.f32.mrb[1].mxu1  ;;  %v2008_v47 = vld [vmem:[%s2824_s6 + $0x48] sm:$0xff]  }
 0x41f   : > { %v791_v43 = vpop.f32.mrb[2].mxu1 }
 0x420   : > { %vm795_vm15 = vcmp.ge.f32.partialorder %v794_v1, 0.0  ;;  %v796_v6 = vmul.f32 0.25, %v794_v1  ;;  %v1835_v7 = vpop.f32.mrb[3].mxu1 }
 0x422   : > { %v797_v44 = vsel %vm795_vm15, %v794_v1, %v796_v6  ;;  %v1154_v1 = vunpack.c.0.s8 %v1153_v61  ;;  %v1137_v6 = vrot.slane %v2523_v46, %v2490_v16 }
 0x423   : > { %v798_v8 = vpack.c.bf16 %v797_v44, %v797_v44 }
 0x424   : > { %v1157_v44 = vsub.s32 %v1154_v1, %v2487_v15 }
 0x425   : > { %800 = vrot.lane.b32.xlu0 %v798_v8, %s2183_s14 }
 0x429   : > { %1125 = vperm.xlu0 %1986, %v1112_v45   ;;  %v1142_v45 = vrot.slane %v2580_v30, %v2586_v32 }
 0x42d   : > { %1990 = vset.pattern.permute.xlu0 %v2184_v37 }
 0x497   : > { %v801_v9 = vpop.permute.xlu0 %800 }
 0x498   : > { %1845 = vmatmul.mubr.msk.bf16.vlgmr.msra.gmra.mrb[8].mxu0 %vm626_vm8, %v801_v9  ;;  %v1147_v9 = vrot.slane %v2580_v30, %v851_v29 }
 0x499   : > { %1849 = vmatpush3.bf16.msra.mxu0 %v2617_v17  ;;  %1864 = vmatprep.mubr.msk.bf16.mxu0 %vm2182_vm13, %v2181_v3 }
 0x49a   : > { %1850 = vmatprep.subr.bf16.mxu0 %v2181_v3 }
 0x49d   : > { %1851 = vmatpush3.bf16.msra.mxu0 %v2008_v47 }
 0x49e   : > { %1852 = vmatprep.subr.bf16.mxu0 %v2181_v3 }
 0x4a1   : > { %1853 = vmatpush3.bf16.msra.mxu0 %v2009_v11 }
 0x4a2   : > { %1854 = vmatprep.subr.bf16.mxu0 %v2181_v3 }
 0x4a5   : > { %1855 = vmatpush3.bf16.msra.mxu0 %v2010_v20 }
 0x4a6   : > { %1856 = vmatprep.subr.bf16.mxu0 %v2181_v3 }
 0x4a8   : > { %v1126_v13 = vpop.permute.xlu0 %1125 }
 0x4a9   : > { %1857 = vmatpush3.bf16.msra.mxu0 %v2011_v23  ;;  %v1132_v43 = vmul.f32 %v1131_v63, %v1126_v13  ;;  %v1148_v21 = vmul.f32 %v1147_v9, %v1126_v13 }
 0x4aa   : > { %1858 = vmatprep.subr.bf16.mxu0 %v2181_v3 }
 0x4ad   : > { %1859 = vmatpush3.bf16.msra.mxu0 %v2012_v26 }
 0x4ae   : > { %1860 = vmatprep.subr.bf16.mxu0 %v2181_v3 }
 0x4b1   : > { %1861 = vmatpush3.bf16.msra.mxu0 %v2013_v33 }
 0x4b2   : > { %1862 = vmatprep.subr.bf16.mxu0 %v2181_v3 }
 0x4b5   : > { %1863 = vmatpush3.bf16.msra.mxu0 %v2014_v4 }
 0x4b8   : > { %1865 = vmatmul.mubr.bf16.vlgmr.msra.gmra.mrb[12].mxu0 %v880_v36 }
 0x56b   : > { %v839_v38 = vpop.f32.mrb[8].mxu0 }
 0x56c   : > { %v845_v39 = vadd.f32 %v839_v38, %v2566_v5  ;;  %v1846_v40 = vpop.f32.mrb[9].mxu0 }
 0x56d   : > { %v842_v42 = vpop.f32.mrb[10].mxu0 }
 0x56e   : > { %v847_v48 = vmul.f32 0.25, %v845_v39  ;;  %v1847_v49 = vpop.f32.mrb[11].mxu0  ;;  %vm846_vm1 = vcmp.ge.f32.partialorder %v845_v39, 0.0 }
 0x570   : > { %v848_v50 = vsel %vm846_vm1, %v845_v39, %v847_v48 }
 0x571   : > { %1115 = vperm.xlu1 %1988, %v848_v50  }
 0x575   : > { %1989 = vset.pattern.permute.xlu1 %v2180_v0 }
 0x576   : > { %1378 = vrot.lane.b32.xlu1 %v1376_v59, %s2183_s14 }
 0x57a   : > { %1041 = vperm.xlu1 %1989, %v2679_v62  }
 0x58b   : > { %v963_v52 = vpop.f32.mrb[12].mxu0 }
 0x58c   : > { %v973_v53 = vadd.f32 %v2667_v51, %v963_v52  ;;  %v1866_v54 = vpop.f32.mrb[13].mxu0 }
 0x58d   : > { %v966_v55 = vpop.f32.mrb[14].mxu0 }
 0x58e   : > { %vm974_vm2 = vcmp.ge.f32.partialorder %v973_v53, 0.0  ;;  %v975_v5 = vmul.f32 0.25, %v973_v53  ;;  %v1867_v56 = vpop.f32.mrb[15].mxu0 }
 0x590   : > { %v976_v57 = vsel %vm974_vm2, %v973_v53, %v975_v5 }
 0x591   : > { %v977_v58 = vpack.c.bf16 %v976_v57, %v976_v57 }
 0x593   : > { %1877 = vmatmul.mubr.msk.bf16.vlgmr.msra.gmra.mrb[4].mxu1 %vm626_vm8, %v977_v58 }
 0x594   : > { %1881 = vmatpush3.bf16.msra.mxu1 %v2617_v17  ;;  %v1121_v17 = vrot.slane %v2580_v30, %v2583_v31 }
 0x595   : > { %1882 = vmatprep.subr.bf16.mxu1 %v2008_v47 }
 0x598   : > { %1883 = vmatpush3.bf16.msra.mxu1 %v2008_v47 }
 0x599   : > { %1884 = vmatprep.subr.bf16.mxu1 %v2009_v11 }
 0x59c   : > { %1885 = vmatpush3.bf16.msra.mxu1 %v2009_v11 }
 0x59d   : > { %1886 = vmatprep.subr.bf16.mxu1 %v2010_v20 }
 0x5a0   : > { %1887 = vmatpush3.bf16.msra.mxu1 %v2010_v20 }
 0x5a1   : > { %1888 = vmatprep.subr.bf16.mxu1 %v2011_v23 }
 0x5a4   : > { %1889 = vmatpush3.bf16.msra.mxu1 %v2011_v23 }
 0x5a5   : > { %1890 = vmatprep.subr.bf16.mxu1 %v2012_v26 }
 0x5a8   : > { %1891 = vmatpush3.bf16.msra.mxu1 %v2012_v26 }
 0x5a9   : > { %1892 = vmatprep.subr.bf16.mxu1 %v2013_v33 }
 0x5ac   : > { %1893 = vmatpush3.bf16.msra.mxu1 %v2013_v33 }
 0x5ad   : > { %1894 = vmatprep.subr.bf16.mxu1 %v2014_v4 }
 0x5b0   : > { %1895 = vmatpush3.bf16.msra.mxu1 %v2014_v4 }
 0x5f0   : > { %v1116_v2 = vpop.permute.xlu1 %1115 }
 0x5f1   : > { %v1122_v7 = vmul.f32 %v1121_v17, %v1116_v2  ;;  %v1143_v11 = vmul.f32 %v1142_v45, %v1116_v2 }
 0x5f3   : > { %v1133_v8 = vadd.f32 %v1132_v43, %v1122_v7  ;;  %v1149_v26 = vadd.f32 %v1148_v21, %v1143_v11 }
 0x5f5   : > { %v1138_v41 = vadd.f32 %v1137_v6, %v1133_v8 }
 0x5f7   : > { %v1151_v47 = vcombine.high %v1138_v41, %v1138_v41  ;;  %v1158_v10 = vrot.slane %v1138_v41, %v1157_v44 }
 0x5f9   : > { %v1165_v19 = vrot.slane %v1151_v47, %v1157_v44  ;;  %v1166_v12 = vcombine.high %v1158_v10, %v1158_v10  ;;  %v1174_v20 = vrot.slane %v1158_v10, %v1157_v44  ;;  %v1446_v47 = vrot.slane %v2523_v46, 3 }
 0x5fb   : > { %v1167_v22 = vcombine.high %v1165_v19, %v1165_v19  ;;  %v1181_v23 = vrot.slane %v1165_v19, %v1157_v44  ;;  %v1188_v24 = vrot.slane %v1166_v12, %v1157_v44  ;;  %v1196_v25 = vcombine.high %v1174_v20, %v1174_v20  ;;  %1447 = vrot.lane.b32.xlu0 %v1446_v47, %s2186_s13 }
 0x5fc   : > { %v1203_v27 = vrot.slane %v1174_v20, %v2490_v16  ;;  %v2187_v20 = vmov 4  }
 0x5fd   : > { %v1198_v33 = vcombine.high %v1188_v24, %v1188_v24  ;;  %v1211_v34 = vrot.slane %v1196_v25, %v2490_v16  ;;  %v1207_v4 = vrot.slane %v1188_v24, %v2490_v16  ;;  %v1195_v29 = vrot.slane %v1167_v22, %v1157_v44  ;;  %1991 = vset.pattern.permute.xlu1 %v2187_v20 }
 0x5fe   : > { %v1240_v30 = vadd.f32 %v1203_v27, %v1149_v26  ;;  %v1219_v35 = vrot.slane %v1181_v23, %v2490_v16  ;;  %v1197_v36 = vcombine.high %v1181_v23, %v1181_v23 }
 0x5ff   : > { %v1241_v37 = vadd.f32 %v1207_v4, %v1149_v26  ;;  %v1215_v38 = vrot.slane %v1198_v33, %v2490_v16  ;;  %v1242_v39 = vadd.f32 %v1211_v34, %v1149_v26  ;;  %v1223_v40 = vrot.slane %v1195_v29, %v2490_v16  ;;  %v1379_v4 = vpop.permute.xlu1 %1378 }
 0x600   : > { %vm1248_vm3 = vcmp.ge.f32.partialorder %v1240_v30, 0.0  ;;  %v1256_v42 = vmul.f32 0.25, %v1240_v30  ;;  %v1244_v48 = vadd.f32 %v1219_v35, %v1149_v26  ;;  %v1199_v49 = vcombine.high %v1195_v29, %v1195_v29 }
 0x601   : > { %vm1249_vm4 = vcmp.ge.f32.partialorder %v1241_v37, 0.0  ;;  %v1257_v50 = vmul.f32 0.25, %v1241_v37  ;;  %v1243_v52 = vadd.f32 %v1215_v38, %v1149_v26  ;;  %vm1250_vm5 = vcmp.ge.f32.partialorder %v1242_v39, 0.0 }
 0x602   : > { %v1264_v53 = vsel %vm1248_vm3, %v1240_v30, %v1256_v42  ;;  %v1258_v54 = vmul.f32 0.25, %v1242_v39  ;;  %v1245_v55 = vadd.f32 %v1223_v40, %v1149_v26  ;;  %vm1252_vm6 = vcmp.ge.f32.partialorder %v1244_v48, 0.0 }
 0x603   : > { %v1265_v5 = vsel %vm1249_vm4, %v1241_v37, %v1257_v50  ;;  %vm1251_vm7 = vcmp.ge.f32.partialorder %v1243_v52, 0.0  ;;  %v1259_v56 = vmul.f32 0.25, %v1243_v52  ;;  %v1260_v57 = vmul.f32 0.25, %v1244_v48 }
 0x604   : > { %v1272_v58 = vpack.c.bf16 %v1265_v5, %v1264_v53  ;;  %vm1253_vm9 = vcmp.ge.f32.partialorder %v1245_v55, 0.0  ;;  %v1261_v59 = vmul.f32 0.25, %v1245_v55  ;;  %v1266_v60 = vsel %vm1250_vm5, %v1242_v39, %v1258_v54 }
 0x605   : > { %v1267_v61 = vsel %vm1251_vm7, %v1243_v52, %v1259_v56  ;;  %v1227_v63 = vrot.slane %v1197_v36, %v2490_v16  ;;  %v1231_v17 = vrot.slane %v1199_v49, %v2490_v16  ;;  %v1268_v1 = vsel %vm1252_vm6, %v1244_v48, %v1260_v57 }
 0x606   : > { %1896 = vmatprep.mubr.bf16.mxu1 %v1272_v58  ;;  %v1273_v13 = vpack.c.bf16 %v1267_v61, %v1266_v60  ;;  %v1269_v2 = vsel %vm1253_vm9, %v1245_v55, %v1261_v59 }
 0x607   : > { %v1274_v43 = vpack.c.bf16 %v1269_v2, %v1268_v1  ;;  %v1246_v6 = vadd.f32 %v1227_v63, %v1149_v26  ;;  %v1247_v7 = vadd.f32 %v1231_v17, %v1149_v26 }
 0x608   : > { %1897 = vmatmul.mubr.bf16.vlgmr.msra.gmra.mrb[8].mxu1 %v1273_v13 }
 0x609   : > { %1900 = vmatprep.mubr.bf16.mxu1 %v1274_v43  ;;  %vm1255_vm10 = vcmp.ge.f32.partialorder %v1247_v7, 0.0  ;;  %v1262_v44 = vmul.f32 0.25, %v1246_v6  ;;  %v1263_v8 = vmul.f32 0.25, %v1247_v7  ;;  %vm1254_vm11 = vcmp.ge.f32.partialorder %v1246_v6, 0.0 }
 0x60b   : > { %v1271_v45 = vsel %vm1255_vm10, %v1247_v7, %v1263_v8  ;;  %v1270_v41 = vsel %vm1254_vm11, %v1246_v6, %v1262_v44  ;;  %v2188_v44 = vmov 5   ;;  %v2189_v8 = vmov 2  }
 0x60c   : > { %v1275_v9 = vpack.c.bf16 %v1271_v45, %v1270_v41  ;;  %v1042_v45 = vpop.permute.xlu1 %1041 }
 0x610   : > { %1901 = vmatmul.mubr.bf16.gmra.mrb[12].mxu1 %v1275_v9 }
 0x666   : > { %v2704_v10 = vpop.f32.mrb[4].mxu1 }
 0x667   : > { %v1878_v11 = vpop.f32.mrb[5].mxu1 }
 0x668   : > { %v1018_v19 = vpop.f32.mrb[6].mxu1 }
 0x669   : > { %v1879_v12 = vpop.f32.mrb[7].mxu1 }
 0x66d   : > { %v1448_v21 = vpop.permute.xlu0 %1447 }
 0x66e   : > { %1904 = vpush %v1448_v21 }
 0x6db   : > { %v1898_v22 = vpop.f32.mrb[8].mxu1 }
 0x6dc   : > { %v1343_v23 = vadd.f32 %v1898_v22, %v2667_v51  ;;  %v1310_v24 = vpop.f32.mrb[9].mxu1 }
 0x6dd   : > { %v1341_v25 = vadd.f32 %v1310_v24, %v2667_v51  ;;  %v1899_v26 = vpop.f32.mrb[10].mxu1 }
 0x6de   : > { %vm1351_vm12 = vcmp.ge.f32.partialorder %v1343_v23, 0.0  ;;  %v1359_v27 = vmul.f32 0.25, %v1343_v23  ;;  %v1344_v33 = vadd.f32 %v1899_v26, %v2667_v51  ;;  %v1313_v34 = vpop.f32.mrb[11].mxu1 }
 0x6df   : > { %vm1349_vm13 = vcmp.ge.f32.partialorder %v1341_v25, 0.0  ;;  %v1357_v29 = vmul.f32 0.25, %v1341_v25  ;;  %v1342_v30 = vadd.f32 %v1313_v34, %v2667_v51 }
 0x6e0   : > { %vm1352_vm14 = vcmp.ge.f32.partialorder %v1344_v33, 0.0  ;;  %v1360_v35 = vmul.f32 0.25, %v1344_v33  ;;  %v1367_v36 = vsel %vm1351_vm12, %v1343_v23, %v1359_v27  ;;  %vm1531_vm12 = vcmask 1041409  }
 0x6e1   : > { %vm1350_vm15 = vcmp.ge.f32.partialorder %v1342_v30, 0.0  ;;  %v1358_v37 = vmul.f32 0.25, %v1342_v30  ;;  %v1383_v38 = vmul.f32 %v1379_v4, %v1367_v36  ;;  %v1365_v40 = vsel %vm1349_vm13, %v1341_v25, %v1357_v29  ;;  %v1034_v29 = vld [vmem:[%s2404_s18] sm:$0x3f]  ;;  %s1905_s18 = spop %1904 }
 0x6e2   : > { %v1368_v39 = vsel %vm1352_vm14, %v1344_v33, %v1360_v35  ;;  %v1381_v55 = vmul.f32 %v1379_v4, %v1365_v40  ;;  %v1024_v33 = vrot.slane %v2523_v46, %v2583_v31  ;;  %v1038_v36 = vrot.slane %v1034_v29, %v2490_v16 }
 0x6e3   : > { %1401 = vrot.lane.b32.xlu0 %v1383_v38, %s2183_s14  ;;  %v1902_v42 = vpop.f32.mrb[12].mxu1  ;;  %v1384_v48 = vmul.f32 %v1379_v4, %v1368_v39  ;;  %v1366_v52 = vsel %vm1350_vm15, %v1342_v30, %v1358_v37  ;;  %v1048_v30 = vrot.slane %v1034_v29, %v2495_v18  ;;  %v2190_v18 = vmov -1.0  }
 0x6e4   : > { %v1347_v49 = vadd.f32 %v1902_v42, %v2667_v51  ;;  %v1326_v50 = vpop.f32.mrb[13].mxu1  ;;  %v1382_v59 = vmul.f32 %v1379_v4, %v1366_v52  ;;  %v1044_v38 = vsub.f32 %v1038_v36, %v1042_v45  ;;  %vm1533_vm15 = vcmask 1042434  }
 0x6e5   : > { %v1345_v53 = vadd.f32 %v1326_v50, %v2667_v51  ;;  %1403 = vrot.lane.b32.xlu1 %v1384_v48, %s2183_s14  ;;  %v1903_v54 = vpop.f32.mrb[14].mxu1 }
 0x6e6   : > { %vm1355_vm0 = vcmp.ge.f32.partialorder %v1347_v49, 0.0  ;;  %v1363_v5 = vmul.f32 0.25, %v1347_v49  ;;  %v1348_v56 = vadd.f32 %v1903_v54, %v2667_v51  ;;  %v1329_v57 = vpop.f32.mrb[15].mxu1  ;;  %v1054_v39 = vmul.f32 %v1044_v38, %v1044_v38 }
 0x6e7   : > { %vm1353_vm1 = vcmp.ge.f32.partialorder %v1345_v53, 0.0  ;;  %v1361_v58 = vmul.f32 0.25, %v1345_v53  ;;  %1397 = vrot.lane.b32.xlu0 %v1381_v55, %s2183_s14  ;;  %v1346_v61 = vadd.f32 %v1329_v57, %v2667_v51  ;;  %vm1066_vm5 = vcmp.ge.f32.partialorder %v1044_v38, 0.0 }
 0x6e8   : > { %v1364_v60 = vmul.f32 0.25, %v1348_v56  ;;  %v1371_v63 = vsel %vm1355_vm0, %v1347_v49, %v1363_v5  ;;  %vm1356_vm2 = vcmp.ge.f32.partialorder %v1348_v56, 0.0  ;;  %v1067_v54 = vsel %vm1066_vm5, 1.0, %v2190_v18 }
 0x6e9   : > { %1399 = vrot.lane.b32.xlu1 %v1382_v59, %s2183_s14  ;;  %v1387_v17 = vmul.f32 %v1379_v4, %v1371_v63  ;;  %v1369_v13 = vsel %vm1353_vm1, %v1345_v53, %v1361_v58  ;;  %v1362_v1 = vmul.f32 0.25, %v1346_v61  ;;  %vm1354_vm3 = vcmp.ge.f32.partialorder %v1346_v61, 0.0 }
 0x6ea   : > { %v1372_v2 = vsel %vm1356_vm2, %v1348_v56, %v1364_v60  ;;  %v1385_v43 = vmul.f32 %v1379_v4, %v1369_v13  ;;  %v1063_v57 = vand.u32 2147483647, %v1044_v38  ;;  %vm1065_vm6 = vcmp.eq.f32.partialorder %v1044_v38, 0.0 }
 0x6eb   : > { %1409 = vrot.lane.b32.xlu0 %v1387_v17, %s2183_s14  ;;  %v1388_v6 = vmul.f32 %v1379_v4, %v1372_v2  ;;  %v1370_v7 = vsel %vm1354_vm3, %v1346_v61, %v1362_v1  ;;  %v1085_v59 = vrot.slane %v1034_v29, %v2583_v31  ;;  %v1090_v60 = vrot.slane %v1034_v29, %v2586_v32 }
 0x6ec   : > { %v1386_v51 = vmul.f32 %v1379_v4, %v1370_v7  ;;  %v2748_v13 = vstv %s1905_s18  ;;  %v1104_v31 = vrot.slane %v1034_v29, %v2577_v28  ;;  %vm1535_vm0 = vcmask 1043459  }
 0x6ed   : > { %1072 = vperm.xlu1 %1991, %v2679_v62   ;;  %vm1539_vm5 = vcmask 1045509  }
 0x6ef   : > { %1405 = vrot.lane.b32.xlu0 %v1385_v43, %s2183_s14 }
 0x6f1   : > { %1411 = vrot.lane.b32.xlu1 %v1388_v6, %s2183_s14 }
 0x6f2   : > { %1993 = vset.pattern.permute.xlu1 %v2189_v8  ;;  %v1498_v8 = vand.u32 127, %v453_v14 }
 0x6f3   : > { %1050 = vperm.xlu0 %1990, %v2679_v62  }
 0x6f4   : > { %v1501_v14 = vsub.s32 %v1498_v8, %v2487_v15 }
 0x6f5   : > { %1407 = vrot.lane.b32.xlu1 %v1386_v51, %s2183_s14 }
 0x6f7   : > { %1992 = vset.pattern.permute.xlu0 %v2188_v44 }
 0x6f8   : > { %1077 = vperm.xlu0 %1992, %v2679_v62  }
 0x6fc   : > { %1994 = vset.pattern.permute.xlu0 %v2180_v0 }
 0x755   : > { %v1402_v41 = vpop.permute.xlu0 %1401 }
 0x756   : > { %v1427_v9 = vsel %vm626_vm8, %v1402_v41, 0.0 }
 0x757   : > { %v1404_v47 = vpop.permute.xlu1 %1403  ;;  %1428 = vadd.xlane.f32.xlu1 %v1427_v9 }
 0x758   : > { %v1430_v11 = vsel %vm626_vm8, %v1404_v47, 0.0 }
 0x759   : > { %v1398_v19 = vpop.permute.xlu0 %1397  ;;  %1431 = vadd.xlane.f32.xlu0 %v1430_v11 }
 0x75a   : > { %v1421_v12 = vsel %vm626_vm8, %v1398_v19, 0.0 }
 0x75b   : > { %v1400_v20 = vpop.permute.xlu1 %1399  ;;  %1422 = vadd.xlane.f32.xlu1 %v1421_v12 }
 0x75c   : > { %v1424_v21 = vsel %vm626_vm8, %v1400_v20, 0.0 }
 0x75d   : > { %v1410_v22 = vpop.permute.xlu0 %1409  ;;  %1425 = vadd.xlane.f32.xlu0 %v1424_v21 }
 0x75e   : > { %v1439_v0 = vsel %vm626_vm8, %v1410_v22, 0.0 }
 0x75f   : > { %1440 = vadd.xlane.f32.xlu1 %v1439_v0 }
 0x761   : > { %v1406_v23 = vpop.permute.xlu0 %1405 }
 0x762   : > { %v1433_v24 = vsel %vm626_vm8, %v1406_v23, 0.0 }
 0x763   : > { %1434 = vadd.xlane.f32.xlu1 %v1433_v24 }
 0x76c   : > { %v1073_v25 = vpop.permute.xlu1 %1072 }
 0x770   : > { %v1412_v26 = vpop.permute.xlu1 %1411 }
 0x771   : > { %v1442_v4 = vsel %vm626_vm8, %v1412_v26, 0.0 }
 0x772   : > { %v1051_v35 = vpop.permute.xlu0 %1050 }
 0x773   : > { %v1053_v37 = vsub.f32 %v1048_v30, %v1051_v35 }
 0x774   : > { %v1408_v27 = vpop.permute.xlu1 %1407  ;;  %1097 = vperm.xlu1 %1993, %v2679_v62  }
 0x775   : > { %v1436_v34 = vsel %vm626_vm8, %v1408_v27, 0.0  ;;  %v1055_v62 = vmul.f32 %v1053_v37, %v1053_v37  ;;  %v1068_v55 = vmul.f32 %v1067_v54, %v1053_v37 }
 0x776   : > { %1437 = vadd.xlane.f32.xlu0 %v1436_v34 }
 0x777   : > { %v1056_v40 = vadd.f32 %v1055_v62, %v1054_v39  ;;  %v1078_v49 = vpop.permute.xlu0 %1077 }
 0x778   : > { %1026 = vrot.lane.b32.xlu1 %v1024_v33, %s2183_s14 }
 0x779   : > { %vm1057_vm4 = vcmp.gt.f32.partialorder %v1056_v40, 0.0 }
 0x77a   : > { %1443 = vadd.xlane.f32.xlu0 %v1442_v4  ;;  %v1060_v46 = vsel %vm1057_vm4, %v1056_v40, 1.0  ;;  %v1721_v50 = vsel %vm1057_vm4, 1.0, %v2181_v3  ;;  %vm1537_vm4 = vcmask 1044484  }
 0x77b   : > { %2015 = vrsqrt.f32 %v1060_v46 }
 0x785   : > { %v2016_v48 = vpop.eup %2015 }
 0x786   : > { %v2742_v53 = vmul.f32 %v2016_v48, %v1721_v50 }
 0x788   : > { %v1069_v56 = vmul.f32 %v1068_v55, %v2742_v53  ;;  %v1064_v58 = vmul.f32 %v1063_v57, %v2742_v53 }
 0x78a   : > { %v1070_v17 = vsel %vm1065_vm6, 1.0, %v1069_v56  ;;  %v1086_v2 = vmul.f32 %v1085_v59, %v1064_v58  ;;  %v1075_v7 = vmul.f32 %v1073_v25, %v1064_v58  ;;  %v1110_v58 = vld [vmem:[#allocation5] sm:$0xff] }
 0x78b   : > { %v1091_v43 = vmul.f32 %v1090_v60, %v1070_v17  ;;  %v1080_v6 = vmul.f32 %v1078_v49, %v1070_v17 }
 0x78d   : > { %v1092_v32 = vadd.f32 %v1091_v43, %v1086_v2  ;;  %v1081_v9 = vadd.f32 %v1080_v6, %v1075_v7 }
 0x78f   : > { %v1105_v23 = vmul.f32 %v1104_v31, %v1092_v32  ;;  %vm1093_vm2 = vcmp.gt.f32.partialorder %v1081_v9, 0.0 }
 0x790   : > { %v1722_v55 = vsel %vm1093_vm2, 1.0, %v2181_v3 }
 0x7e4   : > { %v1429_v42 = vpop.xlane.xlu1 %1428 }
 0x7e5   : > { %v1454_v41 = vadd.f32 %v2748_v13, %v1429_v42 }
 0x7e6   : > { %v1432_v16 = vpop.xlane.xlu0 %1431 }
 0x7e7   : > { %v1470_v0 = vmul.f32 0.25, %v1454_v41  ;;  %v1455_v28 = vadd.f32 %v2748_v13, %v1432_v16  ;;  %vm1462_vm11 = vcmp.ge.f32.partialorder %v1454_v41, 0.0 }
 0x7e8   : > { %v1423_v52 = vpop.xlane.xlu1 %1422 }
 0x7e9   : > { %v1452_v44 = vadd.f32 %v2748_v13, %v1423_v52  ;;  %v1478_v33 = vsel %vm1462_vm11, %v1454_v41, %v1470_v0  ;;  %v1471_v34 = vmul.f32 0.25, %v1455_v28  ;;  %vm1463_vm14 = vcmp.ge.f32.partialorder %v1455_v28, 0.0 }
 0x7ea   : > { %v1426_v61 = vpop.xlane.xlu0 %1425  ;;  %v1510_v35 = vrot.slane %v1478_v33, %v1501_v14  ;;  %vm1553_vm11 = vcmask 1048128  }
 0x7eb   : > { %v1453_v1 = vadd.f32 %v2748_v13, %v1426_v61  ;;  %v1468_v11 = vmul.f32 0.25, %v1452_v44  ;;  %vm1460_vm9 = vcmp.ge.f32.partialorder %v1452_v44, 0.0  ;;  %v1479_v38 = vsel %vm1463_vm14, %v1455_v28, %v1471_v34 }
 0x7ec   : > { %v1441_v5 = vpop.xlane.xlu1 %1440  ;;  %v1514_v49 = vrot.slane %v1479_v38, %v1501_v14 }
 0x7ed   : > { %v1469_v45 = vmul.f32 0.25, %v1453_v1  ;;  %vm1461_vm7 = vcmp.ge.f32.partialorder %v1453_v1, 0.0  ;;  %v1476_v24 = vsel %vm1460_vm9, %v1452_v44, %v1468_v11  ;;  %v1458_v15 = vadd.f32 %v2748_v13, %v1441_v5 }
 0x7ee   : > { %v1502_v4 = vrot.slane %v1476_v24, %v1501_v14  ;;  %vm1543_vm9 = vcmask 1047559  }
 0x7ef   : > { %v1477_v20 = vsel %vm1461_vm7, %v1453_v1, %v1469_v45  ;;  %vm1466_vm1 = vcmp.ge.f32.partialorder %v1458_v15, 0.0  ;;  %v1474_v40 = vmul.f32 0.25, %v1458_v15  ;;  %vm1541_vm7 = vcmask 1046534  }
 0x7f0   : > { %v1435_v63 = vpop.xlane.xlu1 %1434  ;;  %v1506_v26 = vrot.slane %v1477_v20, %v1501_v14 }
 0x7f1   : > { %v1456_v21 = vadd.f32 %v2748_v13, %v1435_v63  ;;  %v1482_v54 = vsel %vm1466_vm1, %v1458_v15, %v1474_v40 }
 0x7f2   : > { %v1532_v29 = vsel %vm1531_vm12, %v1506_v26, %v1502_v4  ;;  %v1526_v60 = vrot.slane %v1482_v54, %v1501_v14 }
 0x7f3   : > { %vm1464_vm13 = vcmp.ge.f32.partialorder %v1456_v21, 0.0  ;;  %v1534_v39 = vsel %vm1533_vm15, %v1510_v35, %v1532_v29 }
 0x7f4   : > { %v1098_v51 = vpop.permute.xlu1 %1097  ;;  %v1536_v16 = vsel %vm1535_vm0, %v1514_v49, %v1534_v39 }
 0x7f5   : > { %v1100_v12 = vmul.f32 %v1098_v51, %v1081_v9 }
 0x7f7   : > { %v1106_v27 = vsub.f32 %v1100_v12, %v1105_v23 }
 0x7f8   : > { %v1027_v47 = vpop.permute.xlu1 %1026 }
 0x7f9   : > { %v1029_v19 = vadd.f32 %v1027_v47, %v2704_v10  ;;  %v1472_v10 = vmul.f32 0.25, %v1456_v21  ;;  %v1107_v30 = vand.u32 2147483647, %v1106_v27 }
 0x7fb   : > { %v1031_v22 = vmul.f32 0.25, %v1029_v19  ;;  %vm1030_vm10 = vcmp.ge.f32.partialorder %v1029_v19, 0.0  ;;  %v1480_v36 = vsel %vm1464_vm13, %v1456_v21, %v1472_v10  ;;  %v1108_v42 = vmul.f32 %v1107_v30, %v2742_v53 }
 0x7fc   : > { %v1518_v46 = vrot.slane %v1480_v36, %v1501_v14 }
 0x7fd   : > { %v1032_v25 = vsel %vm1030_vm10, %v1029_v19, %v1031_v22  ;;  %v1109_v57 = vmul.f32 %v1722_v55, %v1108_v42  ;;  %vm1551_vm10 = vcmask 589312  }
 0x7fe   : > { %1485 = vrot.lane.b32.xlu1 %v1032_v25, %s2183_s14  ;;  %v1538_v56 = vsel %vm1537_vm4, %v1518_v46, %v1536_v16 }
 0x7ff   : > { %v1111_v17 = vmul.f32 %v1110_v58, %v1109_v57 }
 0x803   : > { %v1438_v37 = vpop.xlane.xlu0 %1437 }
 0x804   : > { %v1457_v62 = vadd.f32 %v2748_v13, %v1438_v37 }
 0x806   : > { %vm1465_vm3 = vcmp.ge.f32.partialorder %v1457_v62, 0.0  ;;  %v1473_v48 = vmul.f32 0.25, %v1457_v62 }
 0x807   : > { %v1444_v50 = vpop.xlane.xlu0 %1443 }
 0x808   : > { %v1481_v52 = vsel %vm1465_vm3, %v1457_v62, %v1473_v48  ;;  %v1459_v18 = vadd.f32 %v2748_v13, %v1444_v50 }
 0x809   : > { %v1522_v5 = vrot.slane %v1481_v52, %v1501_v14 }
 0x80a   : > { %vm1467_vm6 = vcmp.ge.f32.partialorder %v1459_v18, 0.0  ;;  %v1475_v53 = vmul.f32 0.25, %v1459_v18 }
 0x80b   : > { %v1540_v59 = vsel %vm1539_vm5, %v1522_v5, %v1538_v56 }
 0x80c   : > { %v1483_v61 = vsel %vm1467_vm6, %v1459_v18, %v1475_v53  ;;  %v1542_v13 = vsel %vm1541_vm7, %v1526_v60, %v1540_v59 }
 0x80d   : > { %v1530_v63 = vrot.slane %v1483_v61, %v1501_v14 }
 0x80f   : > { %v1544_v1 = vsel %vm1543_vm9, %v1530_v63, %v1542_v13 }
 0x810   : > { %v1546_v2 = vmul.f32 %v1544_v1, %v1111_v17 }
 0x812   : > { %1548 = vrot.lane.b32.xlu0 %v1546_v2, %s2183_s14  ;;  %s2103_s14 = scalar_lea.vmem %s2776_s11, 128 }
 0x813   : > { %p2104_p1 = scmp.ne.s32.totalorder %s2776_s11, %s2103_s14  ;;  %p2111_p3 = scmp.lt.s32.totalorder %s2109_s15, %s2103_s14 }
 0x815   : > { %p2105_p6 = pnand %p2104_p1, %p2349_p4  ;;  %p2112_p7 = por %p2111_p3, %p2110_p13 }
 0x817   : > { %p2106_p8 = pneg %p2105_p6 }
 0x819   : > { %p2113_p9 = pnand %p2112_p7, %p2106_p8 }
 0x870   : > { %v1486_v43 = vpop.permute.xlu1 %1485 }
 0x871   : > { %1488 = vst.msk [vmem:[%s375_s26] sm:$0xff] %vm626_vm8, %v1486_v43 }
 0x884   : > { %v1549_v6 = vpop.permute.xlu0 %1548 }
 0x885   : > { %1552 = vst.msk [vmem:[%s375_s26] sm:$0xff] %vm1551_vm10, %v1549_v6 }
 0x886   : > { %1554 = vst.msk [vmem:[%s375_s26] sm:$0xff] %vm1553_vm11, %v2181_v3 }
 0x887   : > { %2116 = shalt.err (!%p2113_p9)
}
 0x888   : > { %s2117_s20 = scalar_lea.hbm %s2774_s17, 128  ;;  %s2121_s26 = scalar_lea.hbm %s2826_s8, 640 }
 0x889   : > { %p2118_p12 = scmp.ne.s32.totalorder %s2774_s17, %s2117_s20  ;;  %p2122_p10 = scmp.lt.u32.totalorder %s2774_s17, %s2826_s8 }
 0x88a   : > { %p2123_p11 = scmp.lt.u32.totalorder %s2121_s26, %s2117_s20  ;;  %p2125_p1 = scmp.lt.u32.totalorder %s2117_s20, %s2774_s17 }
 0x88b   : > { %p2119_p5 = pnand %p2118_p12, %p2349_p4 }
 0x88c   : > { %p2124_p2 = por %p2123_p11, %p2122_p10 }
 0x88d   : > { %p2120_p0 = pneg %p2119_p5 }
 0x88e   : > { %p2126_p6 = por %p2125_p1, %p2124_p2 }
 0x890   : > { %p2127_p8 = pnand %p2126_p6, %p2120_p0 }
 0x892   : > { %2130 = shalt.err (!%p2127_p8)
}
 0x893   : > { %1916 = dma.vmem_to_hbm [thread:$0]  (%p2349_p4), %s2776_s11, 128, %s2774_s17, %s1556_s24  }
 0x894 PF: > { %p1938_p13 = scmp.ge.s32.totalorder %s2173_s30, 2  ;;  %s1581_s19 = sand.u32 1, %s2161_s27  }
 0x895   : > { %p2841_p3 = scmp.ne.s32.totalorder %s2831_s12, 0  ;;  %s1582_s14 = scalar_lea.sflag [#allocation4], %s1581_s19 }
 0x897   : > { %p1930_p7 = pnand %p1938_p13, %p2841_p3 }
 0x899   : > { %2156 = dma.done.wait (!%p1930_p7), %s1582_s14, 128  }
 0x89a   : > { %2158 = vsyncadd (!%p1930_p7), %s1582_s14, 4294967168  ;;  %p22_p9 = scmp.ge.s32.totalorder %s2339_s16, 7   ;;  %s2842_s27 = smov %s2165_s28 }
 0x89b   : > { %s2843_s28 = smov %s2169_s29  ;;  %s2844_s29 = smov %s2355_s22 }
 0x89c   : > { %s2845_s30 = smov %s2339_s16  ;;  %24 = sbr.rel (!%p22_p9) target bundleno = 6 (0x6), region = 111 }
 0x8a3   :  { %1587 = vsyncpa [#allocation3], 1 }
 0x8a4   :  { %1589 = vsyncpa [#allocation3 + $0x1], 1 }
 0x8a5   :  { %1590 = vsyncpa [#allocation6], 1 }
 0x8a6   :  { %1591 = vsyncpa [#allocation4], 1 }
 0x8a7   :  { %1593 = vsyncpa [#allocation4 + $0x1], 1 }

</bundles_post_ra>
